<compile_context>
chip_gen: v7x
topology: tpu7x:2x2x1
jax: 0.10.0
libtpu: 0.0.40
codegen_flags: <defaults>
</compile_context>

<pallas_src>
import jax
import jax.numpy as jnp
from jax.experimental import pallas as pl
from jax.experimental.pallas import tpu as pltpu

# ----------------------------- problem sizes -----------------------------
B = 2          # batch
H = 16         # horizon / sequence length (conv axis)
CX = 4         # x_in_dim
TD = 8         # t_in_dim
COUT = 32      # out_dim (divisible by GroupNorm groups)
K = 5          # conv kernel size
P = K // 2     # 'same' padding
G = 8          # GroupNorm n_groups (Conv1dBlock default)
CG = COUT // G
EPS = 1e-5
HIGHEST = jax.lax.Precision.HIGHEST
DEFAULT = jax.lax.Precision.DEFAULT


def _mish(v):
    # x * tanh(softplus(x)) with PyTorch's softplus overflow threshold (=20)
    sp = jnp.where(v > 20.0, v, jnp.log1p(jnp.exp(jnp.minimum(v, 20.0))))
    return v * jnp.tanh(sp)


# ------------------------------ Pallas kernel -----------------------------
def _make_kernel(bb, mxu_precision):
    """Build the kernel for a batch-tile of `bb` sequences (R = bb*H rows)."""
    R = bb * H
    inv_cnt = 1.0 / float(H * CG)

    def groupnorm_mish(yflat, gamma, beta):
        # yflat: (R, COUT); biased variance over (H, channels-in-group),
        # all stats in exact f32 on VPU/XLU (no MXU round-trip).
        y3 = yflat.reshape(bb, H, COUT)
        s = jnp.sum(y3, axis=1)                                   # (bb, COUT)
        ss = jnp.sum(y3 * y3, axis=1)                             # (bb, COUT)
        mean_g = jnp.sum(s.reshape(bb, G, CG), axis=-1) * inv_cnt   # (bb, G)
        msq_g = jnp.sum(ss.reshape(bb, G, CG), axis=-1) * inv_cnt   # (bb, G)
        var_g = msq_g - mean_g * mean_g
        inv_g = jax.lax.rsqrt(var_g + EPS)
        mean_c = jnp.broadcast_to(mean_g[:, :, None],
                                  (bb, G, CG)).reshape(bb, COUT)  # (bb, COUT)
        inv_c = jnp.broadcast_to(inv_g[:, :, None],
                                 (bb, G, CG)).reshape(bb, COUT)   # (bb, COUT)
        scale = inv_c * gamma                                     # (bb, COUT)
        shift = beta - mean_c * scale                             # (bb, COUT)
        return _mish(y3 * scale[:, None, :] + shift[:, None, :])  # (bb, H, COUT)

    def kernel(x1col_ref, t_ref, w1_ref, w2_ref, wt_ref, vec_ref, out_ref):
        f32 = jnp.float32
        mm_dtype = w1_ref.dtype

        # packed per-channel vectors: one DMA instead of eight
        vecs = vec_ref[...]                                       # (8, COUT)
        b1, g1, be1 = vecs[0:1], vecs[1:2], vecs[2:3]
        b2, g2, be2 = vecs[3:4], vecs[4:5], vecs[5:6]
        bt, br = vecs[6:7], vecs[7:8]

        # ---- block1 conv + residual 1x1 conv fused into ONE matmul ----
        # w1_ref = [w1m | wr-on-centre-tap-rows] -> output is [y1 | res]
        y1res = jnp.dot(x1col_ref[...], w1_ref[...],
                        preferred_element_type=f32,
                        precision=mxu_precision)                  # (R, 2*COUT)
        y1 = y1res[:, :COUT] + b1
        res = y1res[:, COUT:] + br

        h1 = groupnorm_mish(y1, g1, be1)                          # (bb, H, COUT)

        # ---- time_mlp: Mish -> Linear(TD -> COUT) -> broadcast over H ----
        tvec = t_ref[...].reshape(bb, TD)
        tm = jnp.dot(_mish(tvec).astype(mm_dtype), wt_ref[...],
                     preferred_element_type=f32,
                     precision=mxu_precision) + bt                # (bb, COUT)
        h1 = h1 + tm[:, None, :]

        # ---- block2 conv as K tap-shifted matmuls (no 160-lane concat) ----
        h1f = h1.reshape(R, COUT)
        hpos = jax.lax.broadcasted_iota(jnp.int32, (R, COUT), 0) % H

        y2 = None
        for k in range(K):
            d = k - P
            if d == 0:
                z = h1f
            else:
                # sublane rotation: z[r] = h1f[(r + d) % R]; rows whose source
                # falls outside this sequence's [0, H) window are masked to 0.
                z = jnp.concatenate([h1f[d:], h1f[:d]], axis=0)
                valid = jnp.logical_and(hpos + d >= 0, hpos + d < H)
                z = jnp.where(valid, z, 0.0)
            contrib = jnp.dot(z.astype(mm_dtype), w2_ref[k],
                              preferred_element_type=f32,
                              precision=mxu_precision)            # (R, COUT)
            y2 = contrib if y2 is None else y2 + contrib
        y2 = y2 + b2
        h2 = groupnorm_mish(y2, g2, be2)                          # (bb, H, COUT)

        out_ref[...] = (h2 + res.reshape(bb, H, COUT)).astype(out_ref.dtype)

    return kernel


# ------------------------------ wrapper / glue -----------------------------
def xt_resblock_pallas(x, t, p, *, batch_tile=None, matmul_dtype=jnp.float32):
    f32 = jnp.float32
    if batch_tile is None:
        # biggest tile that keeps ~256 rows per grid step (capped at B)
        batch_tile = max(1, min(B, max(1, 256 // H)))
    bb = int(batch_tile)
    assert B % bb == 0, (B, bb)
    grid = (B // bb,)
    R = bb * H

    # conv1 im2col operand built once in XLA (layout work stays outside kernel)
    xp = jnp.pad(x, ((0, 0), (P, P), (0, 0)))
    x1col = jnp.concatenate([xp[:, k:k + H, :] for k in range(K)],
                            axis=-1).reshape(B * H, K * CX)        # (B*H, K*CX)

    # conv1 weight as im2col matrix (row = k*CX + ci), with the residual 1x1
    # conv appended as extra output columns placed on the centre-tap rows.
    w1m = jnp.transpose(p["w1"], (2, 1, 0)).reshape(K * CX, COUT)  # (K*CX, COUT)
    wr = p["wr"][:, :, 0].T                                        # (CX, COUT)
    wr_rows = jnp.zeros((K * CX, COUT), f32).at[P * CX:(P + 1) * CX, :].set(wr)
    w1aug = jnp.concatenate([w1m, wr_rows], axis=1)                # (K*CX, 2*COUT)

    w2s = jnp.transpose(p["w2"], (2, 1, 0))                        # (K, COUT, COUT)
    wt = p["wt"].T                                                 # (TD, COUT)

    # eight per-channel vectors packed into one (8, COUT) operand
    vecs = jnp.stack([p["b1"], p["gn1_g"], p["gn1_b"],
                      p["b2"], p["gn2_g"], p["gn2_b"],
                      p["bt"], p["br"]], axis=0).astype(f32)       # (8, COUT)

    t3 = t.reshape(B, 1, TD).astype(f32)                           # (B, 1, TD)

    mmdt = jnp.dtype(matmul_dtype)
    x1col = x1col.astype(mmdt)
    w1aug = w1aug.astype(mmdt)
    w2s = w2s.astype(mmdt)
    wt = wt.astype(mmdt)
    # exact f32 MXU passes for the f32 demo; bf16 operands use the native path
    mxu_precision = HIGHEST if mmdt == jnp.dtype(jnp.float32) else DEFAULT

    kernel = _make_kernel(bb, mxu_precision)

    in_specs = [
        pl.BlockSpec((R, K * CX), lambda i: (i, 0)),          # x1col: row-tiled
        pl.BlockSpec((bb, 1, TD), lambda i: (i, 0, 0)),       # t:     row-tiled
        pl.BlockSpec((K * CX, 2 * COUT), lambda i: (0, 0)),   # w1aug: resident
        pl.BlockSpec((K, COUT, COUT), lambda i: (0, 0, 0)),   # w2:    resident
        pl.BlockSpec((TD, COUT), lambda i: (0, 0)),           # wt:    resident
        pl.BlockSpec((8, COUT), lambda i: (0, 0)),            # packed vectors
    ]
    out_specs = pl.BlockSpec((bb, H, COUT), lambda i: (i, 0, 0))

    return pl.pallas_call(
        kernel,
        grid=grid,
        in_specs=in_specs,
        out_specs=out_specs,
        out_shape=jax.ShapeDtypeStruct((B, H, COUT), f32),
        compiler_params=pltpu.CompilerParams(
            dimension_semantics=("parallel",)),
    )(x1col, t3, w1aug, w2s, wt, vecs)


# --------------------------- deterministic params ---------------------------
def init_params(key):
    ks = jax.random.split(key, 12)
    p = {}
    p["w1"] = 0.2 * jax.random.normal(ks[0], (COUT, CX, K), jnp.float32)
    p["b1"] = 0.1 * jax.random.normal(ks[1], (COUT,), jnp.float32)
    p["gn1_g"] = 1.0 + 0.1 * jax.random.normal(ks[2], (COUT,), jnp.float32)
    p["gn1_b"] = 0.1 * jax.random.normal(ks[3], (COUT,), jnp.float32)
    p["w2"] = 0.1 * jax.random.normal(ks[4], (COUT, COUT, K), jnp.float32)
    p["b2"] = 0.1 * jax.random.normal(ks[5], (COUT,), jnp.float32)
    p["gn2_g"] = 1.0 + 0.1 * jax.random.normal(ks[6], (COUT,), jnp.float32)
    p["gn2_b"] = 0.1 * jax.random.normal(ks[7], (COUT,), jnp.float32)
    p["wt"] = 0.2 * jax.random.normal(ks[8], (COUT, TD), jnp.float32)   # Linear (out,in)
    p["bt"] = 0.1 * jax.random.normal(ks[9], (COUT,), jnp.float32)
    p["wr"] = 0.2 * jax.random.normal(ks[10], (COUT, CX, 1), jnp.float32)  # 1x1 conv
    p["br"] = 0.1 * jax.random.normal(ks[11], (COUT,), jnp.float32)
    return p


# ------------------------------ plain-JAX reference -------------------------
def ref_forward(x, t, p):
    def conv1d(xbhc, w, b):
        xn = jnp.transpose(xbhc, (0, 2, 1))                 # (B, C, H)
        y = jax.lax.conv_general_dilated(
            xn, w, window_strides=(1,), padding=[(P, P)],
            dimension_numbers=("NCH", "OIH", "NCH"), precision=HIGHEST)
        return jnp.transpose(y + b[None, :, None], (0, 2, 1))

    def groupnorm(ybhc, gamma, beta):
        y = jnp.transpose(ybhc, (0, 2, 1)).reshape(B, G, CG, H)
        mean = y.mean(axis=(2, 3), keepdims=True)
        var = y.var(axis=(2, 3), keepdims=True)             # biased variance
        y = (y - mean) / jnp.sqrt(var + EPS)
        y = y.reshape(B, COUT, H) * gamma[None, :, None] + beta[None, :, None]
        return jnp.transpose(y, (0, 2, 1))

    def mish(v):
        return v * jnp.tanh(jax.nn.softplus(v))

    h1 = mish(groupnorm(conv1d(x, p["w1"], p["b1"]), p["gn1_g"], p["gn1_b"]))
    tm = jnp.dot(mish(t), p["wt"].T, precision=HIGHEST) + p["bt"]
    h1 = h1 + tm[:, None, :]
    h2 = mish(groupnorm(conv1d(h1, p["w2"], p["b2"]), p["gn2_g"], p["gn2_b"]))
    res = jnp.dot(x, p["wr"][:, :, 0].T, precision=HIGHEST) + p["br"]
    return h2 + res


if __name__ == "__main__":
    key = jax.random.PRNGKey(0)
    kx, kt, kp = jax.random.split(key, 3)
    x = jax.random.normal(kx, (B, H, CX), jnp.float32)      # x : b h c
    t = jax.random.normal(kt, (B, TD), jnp.float32)         # t : b d (time embedding)
    params = init_params(kp)

    ref = jax.block_until_ready(ref_forward(x, t, params))

    # (1) default tiling: biggest row tile that fits (single grid step here)
    out = jax.block_until_ready(xt_resblock_pallas(x, t, params))
    assert out.shape == (B, H, COUT), out.shape
    err = float(jnp.max(jnp.abs(out - ref)))
    assert jnp.allclose(out, ref, atol=2e-3, rtol=2e-3), f"max abs err={err}"

    # (2) row-tiled grid (one sequence per step) -> grid=(2,), parallel axis
    #     shards across v7x's two TensorCores; weights stay VMEM-resident.
    out2 = jax.block_until_ready(xt_resblock_pallas(x, t, params, batch_tile=1))
    err2 = float(jnp.max(jnp.abs(out2 - ref)))
    assert jnp.allclose(out2, ref, atol=2e-3, rtol=2e-3), f"max abs err={err2}"

    print("KERNEL_OK")
</pallas_src>

<mosaic_0001>
module attributes {stable_mosaic.version = 11 : i64} {
  func.func @kernel(%arg0: i32, %arg1: memref<32x20xf32, #tpu.memory_space<vmem>>, %arg2: memref<2x1x8xf32, #tpu.memory_space<vmem>>, %arg3: memref<20x64xf32, #tpu.memory_space<vmem>>, %arg4: memref<5x32x32xf32, #tpu.memory_space<vmem>>, %arg5: memref<8x32xf32, #tpu.memory_space<vmem>>, %arg6: memref<8x32xf32, #tpu.memory_space<vmem>>, %arg7: memref<2x16x32xf32, #tpu.memory_space<vmem>>) attributes {dimension_semantics = [#tpu.dimension_semantics<parallel>], iteration_bounds = array<i64: 1>, scalar_prefetch = 0 : i64, scratch_operands = 0 : i64, tpu.core_type = #tpu.core_type<tc>, window_params = [{transform_indices = @transform_0, window_bounds = array<i64: 32, 20>}, {transform_indices = @transform_1, window_bounds = array<i64: 2, 1, 8>}, {pipeline_mode = #tpu.pipeline_mode<synchronous>, transform_indices = @transform_2, window_bounds = array<i64: 20, 64>}, {pipeline_mode = #tpu.pipeline_mode<synchronous>, transform_indices = @transform_3, window_bounds = array<i64: 5, 32, 32>}, {pipeline_mode = #tpu.pipeline_mode<synchronous>, transform_indices = @transform_4, window_bounds = array<i64: 8, 32>}, {pipeline_mode = #tpu.pipeline_mode<synchronous>, transform_indices = @transform_5, window_bounds = array<i64: 8, 32>}, {transform_indices = @transform_6, window_bounds = array<i64: 2, 16, 32>}]} {
    %c0 = arith.constant 0 : index
    %c0_0 = arith.constant 0 : index
    %0 = vector.load %arg6[%c0, %c0_0] : memref<8x32xf32, #tpu.memory_space<vmem>>, vector<8x32xf32>
    %1 = vector.extract_strided_slice %0 {offsets = [0, 0], sizes = [1, 32], strides = [1, 1]} : vector<8x32xf32> to vector<1x32xf32>
    %2 = vector.extract_strided_slice %0 {offsets = [1, 0], sizes = [1, 32], strides = [1, 1]} : vector<8x32xf32> to vector<1x32xf32>
    %3 = vector.extract_strided_slice %0 {offsets = [2, 0], sizes = [1, 32], strides = [1, 1]} : vector<8x32xf32> to vector<1x32xf32>
    %4 = vector.extract_strided_slice %0 {offsets = [3, 0], sizes = [1, 32], strides = [1, 1]} : vector<8x32xf32> to vector<1x32xf32>
    %5 = vector.extract_strided_slice %0 {offsets = [4, 0], sizes = [1, 32], strides = [1, 1]} : vector<8x32xf32> to vector<1x32xf32>
    %6 = vector.extract_strided_slice %0 {offsets = [5, 0], sizes = [1, 32], strides = [1, 1]} : vector<8x32xf32> to vector<1x32xf32>
    %7 = vector.extract_strided_slice %0 {offsets = [6, 0], sizes = [1, 32], strides = [1, 1]} : vector<8x32xf32> to vector<1x32xf32>
    %8 = vector.extract_strided_slice %0 {offsets = [7, 0], sizes = [1, 32], strides = [1, 1]} : vector<8x32xf32> to vector<1x32xf32>
    %c0_1 = arith.constant 0 : index
    %c0_2 = arith.constant 0 : index
    %9 = vector.load %arg1[%c0_1, %c0_2] : memref<32x20xf32, #tpu.memory_space<vmem>>, vector<32x20xf32>
    %c0_3 = arith.constant 0 : index
    %c0_4 = arith.constant 0 : index
    %10 = vector.load %arg3[%c0_3, %c0_4] : memref<20x64xf32, #tpu.memory_space<vmem>>, vector<20x64xf32>
    %cst = arith.constant dense<0.000000e+00> : vector<32x64xf32>
    %11 = tpu.matmul %9, %10, %cst {dimension_numbers = #tpu.dot_dimension_numbers<[1], [0], [0], [1], [0, 0, 1, 1], [], []>, precision = #tpu.contract_precision<fp32>} : vector<32x20xf32>, vector<20x64xf32>, vector<32x64xf32> -> vector<32x64xf32>
    %12 = vector.extract_strided_slice %11 {offsets = [0, 0], sizes = [32, 32], strides = [1, 1]} : vector<32x64xf32> to vector<32x32xf32>
    %13 = vector.broadcast %1 : vector<1x32xf32> to vector<32x32xf32>
    %14 = arith.addf %12, %13 : vector<32x32xf32>
    %15 = vector.extract_strided_slice %11 {offsets = [0, 32], sizes = [32, 32], strides = [1, 1]} : vector<32x64xf32> to vector<32x32xf32>
    %16 = vector.broadcast %8 : vector<1x32xf32> to vector<32x32xf32>
    %17 = arith.addf %15, %16 : vector<32x32xf32>
    %18 = vector.shape_cast %14 : vector<32x32xf32> to vector<2x16x32xf32>
    %cst_5 = arith.constant dense<0.000000e+00> : vector<2x32xf32>
    %19 = vector.multi_reduction <add>, %18, %cst_5 [1] : vector<2x16x32xf32> to vector<2x32xf32>
    %20 = arith.mulf %18, %18 : vector<2x16x32xf32>
    %cst_6 = arith.constant dense<0.000000e+00> : vector<2x32xf32>
    %21 = vector.multi_reduction <add>, %20, %cst_6 [1] : vector<2x16x32xf32> to vector<2x32xf32>
    %22 = vector.shape_cast %19 : vector<2x32xf32> to vector<2x8x4xf32>
    %cst_7 = arith.constant dense<0.000000e+00> : vector<2x8xf32>
    %23 = vector.multi_reduction <add>, %22, %cst_7 [2] : vector<2x8x4xf32> to vector<2x8xf32>
    %cst_8 = arith.constant 1.562500e-02 : f32
    %24 = vector.broadcast %cst_8 : f32 to vector<2x8xf32>
    %25 = arith.mulf %23, %24 : vector<2x8xf32>
    %26 = vector.shape_cast %21 : vector<2x32xf32> to vector<2x8x4xf32>
    %cst_9 = arith.constant dense<0.000000e+00> : vector<2x8xf32>
    %27 = vector.multi_reduction <add>, %26, %cst_9 [2] : vector<2x8x4xf32> to vector<2x8xf32>
    %cst_10 = arith.constant 1.562500e-02 : f32
    %28 = vector.broadcast %cst_10 : f32 to vector<2x8xf32>
    %29 = arith.mulf %27, %28 : vector<2x8xf32>
    %30 = arith.mulf %25, %25 : vector<2x8xf32>
    %31 = arith.subf %29, %30 : vector<2x8xf32>
    %cst_11 = arith.constant 9.99999974E-6 : f32
    %32 = vector.broadcast %cst_11 : f32 to vector<2x8xf32>
    %33 = arith.addf %31, %32 : vector<2x8xf32>
    %34 = math.rsqrt %33 : vector<2x8xf32>
    %35 = vector.shape_cast %25 : vector<2x8xf32> to vector<2x8x1xf32>
    %36 = vector.shape_cast %35 : vector<2x8x1xf32> to vector<2x8x1xf32>
    %37 = vector.broadcast %36 : vector<2x8x1xf32> to vector<2x8x4xf32>
    %38 = vector.shape_cast %37 : vector<2x8x4xf32> to vector<2x32xf32>
    %39 = vector.shape_cast %34 : vector<2x8xf32> to vector<2x8x1xf32>
    %40 = vector.shape_cast %39 : vector<2x8x1xf32> to vector<2x8x1xf32>
    %41 = vector.broadcast %40 : vector<2x8x1xf32> to vector<2x8x4xf32>
    %42 = vector.shape_cast %41 : vector<2x8x4xf32> to vector<2x32xf32>
    %43 = vector.broadcast %2 : vector<1x32xf32> to vector<2x32xf32>
    %44 = arith.mulf %42, %43 : vector<2x32xf32>
    %45 = arith.mulf %38, %44 : vector<2x32xf32>
    %46 = vector.broadcast %3 : vector<1x32xf32> to vector<2x32xf32>
    %47 = arith.subf %46, %45 : vector<2x32xf32>
    %48 = vector.shape_cast %44 : vector<2x32xf32> to vector<2x1x32xf32>
    %49 = vector.broadcast %48 : vector<2x1x32xf32> to vector<2x16x32xf32>
    %50 = arith.mulf %18, %49 : vector<2x16x32xf32>
    %51 = vector.shape_cast %47 : vector<2x32xf32> to vector<2x1x32xf32>
    %52 = vector.broadcast %51 : vector<2x1x32xf32> to vector<2x16x32xf32>
    %53 = arith.addf %50, %52 : vector<2x16x32xf32>
    %cst_12 = arith.constant 2.000000e+01 : f32
    %54 = vector.broadcast %cst_12 : f32 to vector<2x16x32xf32>
    %55 = arith.cmpf ogt, %53, %54 : vector<2x16x32xf32>
    %cst_13 = arith.constant 2.000000e+01 : f32
    %56 = vector.broadcast %cst_13 : f32 to vector<2x16x32xf32>
    %57 = arith.minimumf %53, %56 : vector<2x16x32xf32>
    %58 = math.exp %57 : vector<2x16x32xf32>
    %59 = math.log1p %58 : vector<2x16x32xf32>
    %60 = arith.select %55, %53, %59 : vector<2x16x32xi1>, vector<2x16x32xf32>
    %61 = math.tanh %60 : vector<2x16x32xf32>
    %62 = arith.mulf %53, %61 : vector<2x16x32xf32>
    %c0_14 = arith.constant 0 : index
    %c0_15 = arith.constant 0 : index
    %c0_16 = arith.constant 0 : index
    %63 = vector.load %arg2[%c0_14, %c0_15, %c0_16] : memref<2x1x8xf32, #tpu.memory_space<vmem>>, vector<2x1x8xf32>
    %64 = vector.shape_cast %63 : vector<2x1x8xf32> to vector<2x8xf32>
    %cst_17 = arith.constant 2.000000e+01 : f32
    %65 = vector.broadcast %cst_17 : f32 to vector<2x8xf32>
    %66 = arith.cmpf ogt, %64, %65 : vector<2x8xf32>
    %cst_18 = arith.constant 2.000000e+01 : f32
    %67 = vector.broadcast %cst_18 : f32 to vector<2x8xf32>
    %68 = arith.minimumf %64, %67 : vector<2x8xf32>
    %69 = math.exp %68 : vector<2x8xf32>
    %70 = math.log1p %69 : vector<2x8xf32>
    %71 = arith.select %66, %64, %70 : vector<2x8xi1>, vector<2x8xf32>
    %72 = math.tanh %71 : vector<2x8xf32>
    %73 = arith.mulf %64, %72 : vector<2x8xf32>
    %c0_19 = arith.constant 0 : index
    %c0_20 = arith.constant 0 : index
    %74 = vector.load %arg5[%c0_19, %c0_20] : memref<8x32xf32, #tpu.memory_space<vmem>>, vector<8x32xf32>
    %cst_21 = arith.constant dense<0.000000e+00> : vector<2x32xf32>
    %75 = tpu.matmul %73, %74, %cst_21 {dimension_numbers = #tpu.dot_dimension_numbers<[1], [0], [0], [1], [0, 0, 1, 1], [], []>, precision = #tpu.contract_precision<fp32>} : vector<2x8xf32>, vector<8x32xf32>, vector<2x32xf32> -> vector<2x32xf32>
    %76 = vector.broadcast %7 : vector<1x32xf32> to vector<2x32xf32>
    %77 = arith.addf %75, %76 : vector<2x32xf32>
    %78 = vector.shape_cast %77 : vector<2x32xf32> to vector<2x1x32xf32>
    %79 = vector.broadcast %78 : vector<2x1x32xf32> to vector<2x16x32xf32>
    %80 = arith.addf %62, %79 : vector<2x16x32xf32>
    %81 = vector.shape_cast %80 : vector<2x16x32xf32> to vector<32x32xf32>
    %82 = tpu.iota {dimensions = array<i32: 0>} : vector<32x32xi32>
    %c16_i32 = arith.constant 16 : i32
    %c0_i32 = arith.constant 0 : i32
    %83 = arith.cmpi eq, %c16_i32, %c0_i32 : i32
    %c1_i32 = arith.constant 1 : i32
    %84 = arith.select %83, %c1_i32, %c16_i32 : i32
    %85 = vector.broadcast %84 : i32 to vector<32x32xi32>
    %86 = arith.remsi %82, %85 : vector<32x32xi32>
    %c0_i32_22 = arith.constant 0 : i32
    %87 = vector.broadcast %c0_i32_22 : i32 to vector<32x32xi32>
    %88 = arith.cmpi ne, %86, %87 : vector<32x32xi32>
    %c0_i32_23 = arith.constant 0 : i32
    %89 = vector.broadcast %c0_i32_23 : i32 to vector<32x32xi32>
    %90 = arith.cmpi slt, %86, %89 : vector<32x32xi32>
    %c0_i32_24 = arith.constant 0 : i32
    %91 = arith.cmpi slt, %84, %c0_i32_24 : i32
    %92 = vector.broadcast %91 : i1 to vector<32x32xi1>
    %93 = vector.broadcast %92 : vector<32x32xi1> to vector<32x32xi1>
    %94 = arith.xori %90, %93 : vector<32x32xi1>
    %95 = arith.andi %94, %88 : vector<32x32xi1>
    %96 = vector.broadcast %84 : i32 to vector<32x32xi32>
    %97 = arith.addi %86, %96 : vector<32x32xi32>
    %98 = arith.select %95, %97, %86 : vector<32x32xi1>, vector<32x32xi32>
    %99 = vector.extract_strided_slice %81 {offsets = [30, 0], sizes = [2, 32], strides = [1, 1]} : vector<32x32xf32> to vector<2x32xf32>
    %100 = vector.extract_strided_slice %81 {offsets = [0, 0], sizes = [30, 32], strides = [1, 1]} : vector<32x32xf32> to vector<30x32xf32>
    %101 = tpu.concatenate %99, %100 in 0 : vector<2x32xf32>, vector<30x32xf32> -> vector<32x32xf32>
    %c-2_i32 = arith.constant -2 : i32
    %102 = vector.broadcast %c-2_i32 : i32 to vector<32x32xi32>
    %103 = arith.addi %98, %102 : vector<32x32xi32>
    %c0_i32_25 = arith.constant 0 : i32
    %104 = vector.broadcast %c0_i32_25 : i32 to vector<32x32xi32>
    %105 = arith.cmpi sge, %103, %104 : vector<32x32xi32>
    %c-2_i32_26 = arith.constant -2 : i32
    %106 = vector.broadcast %c-2_i32_26 : i32 to vector<32x32xi32>
    %107 = arith.addi %98, %106 : vector<32x32xi32>
    %c16_i32_27 = arith.constant 16 : i32
    %108 = vector.broadcast %c16_i32_27 : i32 to vector<32x32xi32>
    %109 = arith.cmpi slt, %107, %108 : vector<32x32xi32>
    %110 = arith.andi %105, %109 : vector<32x32xi1>
    %cst_28 = arith.constant 0.000000e+00 : f32
    %111 = vector.broadcast %cst_28 : f32 to vector<32x32xf32>
    %112 = arith.select %110, %101, %111 : vector<32x32xi1>, vector<32x32xf32>
    %c0_29 = arith.constant 0 : index
    %c0_30 = arith.constant 0 : index
    %c0_31 = arith.constant 0 : index
    %113 = vector.load %arg4[%c0_29, %c0_30, %c0_31] : memref<5x32x32xf32, #tpu.memory_space<vmem>>, vector<1x32x32xf32>
    %114 = vector.shape_cast %113 : vector<1x32x32xf32> to vector<32x32xf32>
    %cst_32 = arith.constant dense<0.000000e+00> : vector<32x32xf32>
    %115 = tpu.matmul %112, %114, %cst_32 {dimension_numbers = #tpu.dot_dimension_numbers<[1], [0], [0], [1], [0, 0, 1, 1], [], []>, precision = #tpu.contract_precision<fp32>} : vector<32x32xf32>, vector<32x32xf32>, vector<32x32xf32> -> vector<32x32xf32>
    %116 = vector.extract_strided_slice %81 {offsets = [31, 0], sizes = [1, 32], strides = [1, 1]} : vector<32x32xf32> to vector<1x32xf32>
    %117 = vector.extract_strided_slice %81 {offsets = [0, 0], sizes = [31, 32], strides = [1, 1]} : vector<32x32xf32> to vector<31x32xf32>
    %118 = tpu.concatenate %116, %117 in 0 : vector<1x32xf32>, vector<31x32xf32> -> vector<32x32xf32>
    %c-1_i32 = arith.constant -1 : i32
    %119 = vector.broadcast %c-1_i32 : i32 to vector<32x32xi32>
    %120 = arith.addi %98, %119 : vector<32x32xi32>
    %c0_i32_33 = arith.constant 0 : i32
    %121 = vector.broadcast %c0_i32_33 : i32 to vector<32x32xi32>
    %122 = arith.cmpi sge, %120, %121 : vector<32x32xi32>
    %c-1_i32_34 = arith.constant -1 : i32
    %123 = vector.broadcast %c-1_i32_34 : i32 to vector<32x32xi32>
    %124 = arith.addi %98, %123 : vector<32x32xi32>
    %c16_i32_35 = arith.constant 16 : i32
    %125 = vector.broadcast %c16_i32_35 : i32 to vector<32x32xi32>
    %126 = arith.cmpi slt, %124, %125 : vector<32x32xi32>
    %127 = arith.andi %122, %126 : vector<32x32xi1>
    %cst_36 = arith.constant 0.000000e+00 : f32
    %128 = vector.broadcast %cst_36 : f32 to vector<32x32xf32>
    %129 = arith.select %127, %118, %128 : vector<32x32xi1>, vector<32x32xf32>
    %c1 = arith.constant 1 : index
    %c0_37 = arith.constant 0 : index
    %c0_38 = arith.constant 0 : index
    %130 = vector.load %arg4[%c1, %c0_37, %c0_38] : memref<5x32x32xf32, #tpu.memory_space<vmem>>, vector<1x32x32xf32>
    %131 = vector.shape_cast %130 : vector<1x32x32xf32> to vector<32x32xf32>
    %cst_39 = arith.constant dense<0.000000e+00> : vector<32x32xf32>
    %132 = tpu.matmul %129, %131, %cst_39 {dimension_numbers = #tpu.dot_dimension_numbers<[1], [0], [0], [1], [0, 0, 1, 1], [], []>, precision = #tpu.contract_precision<fp32>} : vector<32x32xf32>, vector<32x32xf32>, vector<32x32xf32> -> vector<32x32xf32>
    %133 = arith.addf %115, %132 : vector<32x32xf32>
    %c2 = arith.constant 2 : index
    %c0_40 = arith.constant 0 : index
    %c0_41 = arith.constant 0 : index
    %134 = vector.load %arg4[%c2, %c0_40, %c0_41] : memref<5x32x32xf32, #tpu.memory_space<vmem>>, vector<1x32x32xf32>
    %135 = vector.shape_cast %134 : vector<1x32x32xf32> to vector<32x32xf32>
    %cst_42 = arith.constant dense<0.000000e+00> : vector<32x32xf32>
    %136 = tpu.matmul %81, %135, %cst_42 {dimension_numbers = #tpu.dot_dimension_numbers<[1], [0], [0], [1], [0, 0, 1, 1], [], []>, precision = #tpu.contract_precision<fp32>} : vector<32x32xf32>, vector<32x32xf32>, vector<32x32xf32> -> vector<32x32xf32>
    %137 = arith.addf %133, %136 : vector<32x32xf32>
    %138 = vector.extract_strided_slice %81 {offsets = [1, 0], sizes = [31, 32], strides = [1, 1]} : vector<32x32xf32> to vector<31x32xf32>
    %139 = vector.extract_strided_slice %81 {offsets = [0, 0], sizes = [1, 32], strides = [1, 1]} : vector<32x32xf32> to vector<1x32xf32>
    %140 = tpu.concatenate %138, %139 in 0 : vector<31x32xf32>, vector<1x32xf32> -> vector<32x32xf32>
    %c1_i32_43 = arith.constant 1 : i32
    %141 = vector.broadcast %c1_i32_43 : i32 to vector<32x32xi32>
    %142 = arith.addi %98, %141 : vector<32x32xi32>
    %c0_i32_44 = arith.constant 0 : i32
    %143 = vector.broadcast %c0_i32_44 : i32 to vector<32x32xi32>
    %144 = arith.cmpi sge, %142, %143 : vector<32x32xi32>
    %c1_i32_45 = arith.constant 1 : i32
    %145 = vector.broadcast %c1_i32_45 : i32 to vector<32x32xi32>
    %146 = arith.addi %98, %145 : vector<32x32xi32>
    %c16_i32_46 = arith.constant 16 : i32
    %147 = vector.broadcast %c16_i32_46 : i32 to vector<32x32xi32>
    %148 = arith.cmpi slt, %146, %147 : vector<32x32xi32>
    %149 = arith.andi %144, %148 : vector<32x32xi1>
    %cst_47 = arith.constant 0.000000e+00 : f32
    %150 = vector.broadcast %cst_47 : f32 to vector<32x32xf32>
    %151 = arith.select %149, %140, %150 : vector<32x32xi1>, vector<32x32xf32>
    %c3 = arith.constant 3 : index
    %c0_48 = arith.constant 0 : index
    %c0_49 = arith.constant 0 : index
    %152 = vector.load %arg4[%c3, %c0_48, %c0_49] : memref<5x32x32xf32, #tpu.memory_space<vmem>>, vector<1x32x32xf32>
    %153 = vector.shape_cast %152 : vector<1x32x32xf32> to vector<32x32xf32>
    %cst_50 = arith.constant dense<0.000000e+00> : vector<32x32xf32>
    %154 = tpu.matmul %151, %153, %cst_50 {dimension_numbers = #tpu.dot_dimension_numbers<[1], [0], [0], [1], [0, 0, 1, 1], [], []>, precision = #tpu.contract_precision<fp32>} : vector<32x32xf32>, vector<32x32xf32>, vector<32x32xf32> -> vector<32x32xf32>
    %155 = arith.addf %137, %154 : vector<32x32xf32>
    %156 = vector.extract_strided_slice %81 {offsets = [2, 0], sizes = [30, 32], strides = [1, 1]} : vector<32x32xf32> to vector<30x32xf32>
    %157 = vector.extract_strided_slice %81 {offsets = [0, 0], sizes = [2, 32], strides = [1, 1]} : vector<32x32xf32> to vector<2x32xf32>
    %158 = tpu.concatenate %156, %157 in 0 : vector<30x32xf32>, vector<2x32xf32> -> vector<32x32xf32>
    %c2_i32 = arith.constant 2 : i32
    %159 = vector.broadcast %c2_i32 : i32 to vector<32x32xi32>
    %160 = arith.addi %98, %159 : vector<32x32xi32>
    %c0_i32_51 = arith.constant 0 : i32
    %161 = vector.broadcast %c0_i32_51 : i32 to vector<32x32xi32>
    %162 = arith.cmpi sge, %160, %161 : vector<32x32xi32>
    %c2_i32_52 = arith.constant 2 : i32
    %163 = vector.broadcast %c2_i32_52 : i32 to vector<32x32xi32>
    %164 = arith.addi %98, %163 : vector<32x32xi32>
    %c16_i32_53 = arith.constant 16 : i32
    %165 = vector.broadcast %c16_i32_53 : i32 to vector<32x32xi32>
    %166 = arith.cmpi slt, %164, %165 : vector<32x32xi32>
    %167 = arith.andi %162, %166 : vector<32x32xi1>
    %cst_54 = arith.constant 0.000000e+00 : f32
    %168 = vector.broadcast %cst_54 : f32 to vector<32x32xf32>
    %169 = arith.select %167, %158, %168 : vector<32x32xi1>, vector<32x32xf32>
    %c4 = arith.constant 4 : index
    %c0_55 = arith.constant 0 : index
    %c0_56 = arith.constant 0 : index
    %170 = vector.load %arg4[%c4, %c0_55, %c0_56] : memref<5x32x32xf32, #tpu.memory_space<vmem>>, vector<1x32x32xf32>
    %171 = vector.shape_cast %170 : vector<1x32x32xf32> to vector<32x32xf32>
    %cst_57 = arith.constant dense<0.000000e+00> : vector<32x32xf32>
    %172 = tpu.matmul %169, %171, %cst_57 {dimension_numbers = #tpu.dot_dimension_numbers<[1], [0], [0], [1], [0, 0, 1, 1], [], []>, precision = #tpu.contract_precision<fp32>} : vector<32x32xf32>, vector<32x32xf32>, vector<32x32xf32> -> vector<32x32xf32>
    %173 = arith.addf %155, %172 : vector<32x32xf32>
    %174 = vector.broadcast %4 : vector<1x32xf32> to vector<32x32xf32>
    %175 = arith.addf %173, %174 : vector<32x32xf32>
    %176 = vector.shape_cast %175 : vector<32x32xf32> to vector<2x16x32xf32>
    %cst_58 = arith.constant dense<0.000000e+00> : vector<2x32xf32>
    %177 = vector.multi_reduction <add>, %176, %cst_58 [1] : vector<2x16x32xf32> to vector<2x32xf32>
    %178 = arith.mulf %176, %176 : vector<2x16x32xf32>
    %cst_59 = arith.constant dense<0.000000e+00> : vector<2x32xf32>
    %179 = vector.multi_reduction <add>, %178, %cst_59 [1] : vector<2x16x32xf32> to vector<2x32xf32>
    %180 = vector.shape_cast %177 : vector<2x32xf32> to vector<2x8x4xf32>
    %cst_60 = arith.constant dense<0.000000e+00> : vector<2x8xf32>
    %181 = vector.multi_reduction <add>, %180, %cst_60 [2] : vector<2x8x4xf32> to vector<2x8xf32>
    %cst_61 = arith.constant 1.562500e-02 : f32
    %182 = vector.broadcast %cst_61 : f32 to vector<2x8xf32>
    %183 = arith.mulf %181, %182 : vector<2x8xf32>
    %184 = vector.shape_cast %179 : vector<2x32xf32> to vector<2x8x4xf32>
    %cst_62 = arith.constant dense<0.000000e+00> : vector<2x8xf32>
    %185 = vector.multi_reduction <add>, %184, %cst_62 [2] : vector<2x8x4xf32> to vector<2x8xf32>
    %cst_63 = arith.constant 1.562500e-02 : f32
    %186 = vector.broadcast %cst_63 : f32 to vector<2x8xf32>
    %187 = arith.mulf %185, %186 : vector<2x8xf32>
    %188 = arith.mulf %183, %183 : vector<2x8xf32>
    %189 = arith.subf %187, %188 : vector<2x8xf32>
    %cst_64 = arith.constant 9.99999974E-6 : f32
    %190 = vector.broadcast %cst_64 : f32 to vector<2x8xf32>
    %191 = arith.addf %189, %190 : vector<2x8xf32>
    %192 = math.rsqrt %191 : vector<2x8xf32>
    %193 = vector.shape_cast %183 : vector<2x8xf32> to vector<2x8x1xf32>
    %194 = vector.shape_cast %193 : vector<2x8x1xf32> to vector<2x8x1xf32>
    %195 = vector.broadcast %194 : vector<2x8x1xf32> to vector<2x8x4xf32>
    %196 = vector.shape_cast %195 : vector<2x8x4xf32> to vector<2x32xf32>
    %197 = vector.shape_cast %192 : vector<2x8xf32> to vector<2x8x1xf32>
    %198 = vector.shape_cast %197 : vector<2x8x1xf32> to vector<2x8x1xf32>
    %199 = vector.broadcast %198 : vector<2x8x1xf32> to vector<2x8x4xf32>
    %200 = vector.shape_cast %199 : vector<2x8x4xf32> to vector<2x32xf32>
    %201 = vector.broadcast %5 : vector<1x32xf32> to vector<2x32xf32>
    %202 = arith.mulf %200, %201 : vector<2x32xf32>
    %203 = arith.mulf %196, %202 : vector<2x32xf32>
    %204 = vector.broadcast %6 : vector<1x32xf32> to vector<2x32xf32>
    %205 = arith.subf %204, %203 : vector<2x32xf32>
    %206 = vector.shape_cast %202 : vector<2x32xf32> to vector<2x1x32xf32>
    %207 = vector.broadcast %206 : vector<2x1x32xf32> to vector<2x16x32xf32>
    %208 = arith.mulf %176, %207 : vector<2x16x32xf32>
    %209 = vector.shape_cast %205 : vector<2x32xf32> to vector<2x1x32xf32>
    %210 = vector.broadcast %209 : vector<2x1x32xf32> to vector<2x16x32xf32>
    %211 = arith.addf %208, %210 : vector<2x16x32xf32>
    %cst_65 = arith.constant 2.000000e+01 : f32
    %212 = vector.broadcast %cst_65 : f32 to vector<2x16x32xf32>
    %213 = arith.cmpf ogt, %211, %212 : vector<2x16x32xf32>
    %cst_66 = arith.constant 2.000000e+01 : f32
    %214 = vector.broadcast %cst_66 : f32 to vector<2x16x32xf32>
    %215 = arith.minimumf %211, %214 : vector<2x16x32xf32>
    %216 = math.exp %215 : vector<2x16x32xf32>
    %217 = math.log1p %216 : vector<2x16x32xf32>
    %218 = arith.select %213, %211, %217 : vector<2x16x32xi1>, vector<2x16x32xf32>
    %219 = math.tanh %218 : vector<2x16x32xf32>
    %220 = arith.mulf %211, %219 : vector<2x16x32xf32>
    %221 = vector.shape_cast %17 : vector<32x32xf32> to vector<2x16x32xf32>
    %222 = arith.addf %220, %221 : vector<2x16x32xf32>
    %c0_67 = arith.constant 0 : index
    %c0_68 = arith.constant 0 : index
    %c0_69 = arith.constant 0 : index
    %223 = vector.load %arg7[%c0_67, %c0_68, %c0_69] : memref<2x16x32xf32, #tpu.memory_space<vmem>>, vector<2x16x32xf32>
    tpu.vector_store %arg7[%c0_67, %c0_68, %c0_69], %222 {strides = array<i32>} : memref<2x16x32xf32, #tpu.memory_space<vmem>>, vector<2x16x32xf32>,
    return
  }
  func.func @transform_0(%arg0: i32) -> (i32, i32) {
    %c0_i32 = arith.constant 0 : i32
    %c0_i32_0 = arith.constant 0 : i32
    return %arg0, %c0_i32 : i32, i32
  }
  func.func @transform_1(%arg0: i32) -> (i32, i32, i32) {
    %c0_i32 = arith.constant 0 : i32
    %c0_i32_0 = arith.constant 0 : i32
    %c0_i32_1 = arith.constant 0 : i32
    return %arg0, %c0_i32, %c0_i32_0 : i32, i32, i32
  }
  func.func @transform_2(%arg0: i32) -> (i32, i32) {
    %c0_i32 = arith.constant 0 : i32
    %c0_i32_0 = arith.constant 0 : i32
    %c0_i32_1 = arith.constant 0 : i32
    return %c0_i32, %c0_i32_0 : i32, i32
  }
  func.func @transform_3(%arg0: i32) -> (i32, i32, i32) {
    %c0_i32 = arith.constant 0 : i32
    %c0_i32_0 = arith.constant 0 : i32
    %c0_i32_1 = arith.constant 0 : i32
    %c0_i32_2 = arith.constant 0 : i32
    return %c0_i32, %c0_i32_0, %c0_i32_1 : i32, i32, i32
  }
  func.func @transform_4(%arg0: i32) -> (i32, i32) {
    %c0_i32 = arith.constant 0 : i32
    %c0_i32_0 = arith.constant 0 : i32
    %c0_i32_1 = arith.constant 0 : i32
    return %c0_i32, %c0_i32_0 : i32, i32
  }
  func.func @transform_5(%arg0: i32) -> (i32, i32) {
    %c0_i32 = arith.constant 0 : i32
    %c0_i32_0 = arith.constant 0 : i32
    %c0_i32_1 = arith.constant 0 : i32
    return %c0_i32, %c0_i32_0 : i32, i32
  }
  func.func @transform_6(%arg0: i32) -> (i32, i32, i32) {
    %c0_i32 = arith.constant 0 : i32
    %c0_i32_0 = arith.constant 0 : i32
    %c0_i32_1 = arith.constant 0 : i32
    return %arg0, %c0_i32, %c0_i32_0 : i32, i32, i32
  }
}

</mosaic_0001>

<bundles_post_ra>
// kernel: tpu_custom_call.1
= control target key start
LH: loop header
LB: loop body
LE: loop exit
PB: predicated region body
PF: predicated region fallthrough
CT: control target
= control target key end

     0   :  { %11 = vsyncpa [#allocation3], 0  ;;  %s8642_s0 = inlined_call_operand.vmem [shape: f32[32,20], index: 0, kind: input, shape index: {}]   ;;  %s8643_s1 = inlined_call_operand.vmem [shape: f32[2,1,8], index: 1, kind: input, shape index: {}]   ;;  %s8644_s2 = inlined_call_operand.vmem [shape: f32[20,64], index: 2, kind: input, shape index: {}]   ;;  %s8645_s3 = inlined_call_operand.hbm [shape: f32[5,32,32], index: 3, kind: input, shape index: {}]   ;;  %s8646_s4 = inlined_call_operand.vmem [shape: f32[8,32], index: 4, kind: input, shape index: {}]   ;;  %s8647_s5 = inlined_call_operand.vmem [shape: f32[8,32], index: 5, kind: input, shape index: {}]   ;;  %s8648_s6 = inlined_call_operand.hbm [shape: f32[2,16,32], index: 6, kind: output, shape index: {}]  }
   0x1   :  { %12 = vsyncpa [#allocation4], 0  ;;  %s7256_s21 = smov [#allocation2]   ;;  %s7208_s25 = scalar_lea.hbm %s8645_s3, 2560 }
   0x2   :  { %s24_s22 = sshll.u32 %s7256_s21, 4  ;;  %p7209_p0 = scmp.ne.s32.totalorder %s8645_s3, %s7208_s25  ;;  %s25_s22 = int_to_ptr.vmem [resolvable:$true] %s24_s22 }
   0x3   :  { %p7212_p1 = scmp.lt.u32.totalorder %s7208_s25, %s8645_s3 }
   0x5   :  { %p7214_p2 = pnand %p7212_p1, %p7209_p0 }
   0x7   :  { %7217 = shalt.err (!%p7214_p2)
}
   0x8   :  { %s7218_s30 = scalar_lea.vmem %s25_s22, 2560  ;;  %p7223_p4 = scmp.lt.s32.totalorder %s25_s22, %s25_s22 }
   0x9   :  { %p7219_p3 = scmp.ne.s32.totalorder %s25_s22, %s7218_s30  ;;  %p7224_p5 = scmp.lt.s32.totalorder %s7218_s30, %s7218_s30 }
   0xb   :  { %p7225_p6 = por %p7224_p5, %p7223_p4 }
   0xd   :  { %p7226_p7 = pnand %p7225_p6, %p7219_p3 }
   0xf   :  { %7229 = shalt.err (!%p7226_p7)
}
  0x10   :  { %s7257_s7 = smov 128   ;;  %s7258_s8 = smov 8  }
  0x11   :  { %30 = dma.hbm_to_vmem [thread:$0]  %s8645_s3, 2560, %s25_s22, [#allocation3], %s7257_s7, %s7257_s7, %s7258_s8  }
  0x12   :  { %7252 = dma.done.wait [#allocation3], 2560  }
  0x13   :  { %7253 = vsyncadd [#allocation3], 4294964736  ;;  %vm59_vm0 = vcmask 1043456   ;;  %vm46_vm1 = vcmask 162816   ;;  %v43_v0 = vld [vmem:[%s8644_s2] sm:$0xff]  ;;  %v44_v1 = vld [vmem:[%s8644_s2 + $0x8] sm:$0xff]  ;;  %v664_v51 = vlaneseq }
  0x14   :  { %v45_v2 = vld [vmem:[%s8644_s2 + $0x10] sm:$0xf]  ;;  %v64_v3 = vand.u32 4294901760, %v43_v0  ;;  %v67_v4 = vand.u32 4294901760, %v44_v1  ;;  %v39_v6 = vld [vmem:[%s8642_s0] sm:$0xff]  ;;  %v40_v7 = vld [vmem:[%s8642_s0 + $0x8] sm:$0xff] }
  0x15   :  { %v61_v5 = vsel %vm59_vm0, %v45_v2, 0  ;;  %v41_v8 = vld [vmem:[%s8642_s0 + $0x10] sm:$0xff]  ;;  %v48_v10 = vsel %vm46_vm1, %v39_v6, 0  ;;  %v51_v11 = vsel %vm46_vm1, %v40_v7, 0  ;;  %v42_v13 = vld [vmem:[%s8642_s0 + $0x18] sm:$0xff]  ;;  %v7396_v52 = vshrl.u32 %v664_v51, 7 }
  0x16   :  { %v7348_v9 = vand.u32 4294901760, %v61_v5  ;;  %v54_v12 = vsel %vm46_vm1, %v41_v8, 0  ;;  %v7356_v14 = vpack.c.bf16 %v67_v4, %v64_v3  ;;  %v7358_v15 = vand.u32 4294901760, %v48_v10  ;;  %v7404_v54 = vld [vmem:[%s8647_s5] sm:$0xff]  ;;  %s7259_s24 = smov 120   ;;  %s7260_s25 = smov 124  }
  0x17   :  { %v7360_v16 = vand.u32 4294901760, %v51_v11  ;;  %v173_v17 = vsub.f32 %v43_v0, %v64_v3  ;;  %v180_v18 = vsub.f32 %v44_v1, %v67_v4  ;;  %v7362_v19 = vand.u32 4294901760, %v54_v12  ;;  %s7261_s26 = smov 112   ;;  %s7262_s27 = smov 116  }
  0x18   :  { %v57_v20 = vsel %vm46_vm1, %v42_v13, 0  ;;  %v187_v21 = vsub.f32 %v61_v5, %v7348_v9  ;;  %6700 = vmatprep.subr.bf16.mxu0 %v7356_v14  ;;  %v132_v22 = vsub.f32 %v48_v10, %v7358_v15  ;;  %v7399_v53 = vsub.s32 0, %v7396_v52  ;;  %s7263_s28 = smov 104   ;;  %s7264_s29 = smov 108  }
  0x19   :  { %v142_v23 = vsub.f32 %v51_v11, %v7360_v16  ;;  %v174_v24 = vand.u32 4294901760, %v173_v17  ;;  %v7369_v25 = vand.u32 4294901760, %v57_v20  ;;  %6702 = vmatpush3.bf16.msra.mxu0 %v7356_v14  ;;  %v181_v26 = vand.u32 4294901760, %v180_v18  ;;  %s7265_s30 = smov 100   ;;  %s7273_s15 = smov 16  }
  0x1a   :  { %v152_v27 = vsub.f32 %v54_v12, %v7362_v19  ;;  %v188_v28 = vand.u32 4294901760, %v187_v21  ;;  %6181 = vmatprep.subr.mxu0 %v7348_v9  ;;  %v133_v29 = vand.u32 4294901760, %v132_v22  ;;  %v6707_v49 = vpack.c.bf16 %v180_v18, %v173_v17  ;;  %8681 = vst [vmem:[#allocation8_spill] sm:$0xff] %v7399_v53  ;;  %s7274_s16 = smov 20   ;;  %s7275_s3 = smov 24  }
  0x1b   :  { %v143_v30 = vand.u32 4294901760, %v142_v23  ;;  %v175_v31 = vsub.f32 %v173_v17, %v174_v24  ;;  %v162_v32 = vsub.f32 %v57_v20, %v7369_v25  ;;  %v182_v33 = vsub.f32 %v180_v18, %v181_v26  ;;  %s7276_s17 = smov 28   ;;  %s7278_s2 = smov 96  }
  0x1c   :  { %v153_v34 = vand.u32 4294901760, %v152_v27  ;;  %v189_v35 = vsub.f32 %v187_v21, %v188_v28  ;;  %v134_v36 = vsub.f32 %v132_v22, %v133_v29  ;;  %v6715_v50 = vpack.c.bf16 %v181_v26, %v174_v24  ;;  %s7279_s22 = smov [#allocation5]  }
  0x1d   :  { %v144_v37 = vsub.f32 %v142_v23, %v143_v30  ;;  %v176_v38 = vand.u32 4294901760, %v175_v31  ;;  %v163_v39 = vand.u32 4294901760, %v162_v32  ;;  %6182 = vmatpush3.msra.mxu0 %v7348_v9  ;;  %v183_v40 = vand.u32 4294901760, %v182_v33  ;;  %s5871_s0 = sshll.u32 %s7279_s22, 4  ;;  %s5872_s0 = int_to_ptr.vmem [resolvable:$true] %s5871_s0 }
  0x1e   :  { %v154_v41 = vsub.f32 %v152_v27, %v153_v34  ;;  %v135_v42 = vand.u32 4294901760, %v134_v36  ;;  %v190_v47 = vand.u32 4294901760, %v189_v35  ;;  %v667_v55 = vrot.slane %v7404_v54, %v7399_v53  ;;  %s7230_s23 = scalar_lea.vmem %s5872_s0, 512  ;;  %p7235_p9 = scmp.lt.s32.totalorder %s5872_s0, %s5872_s0 }
  0x1f   :  { %v145_v43 = vand.u32 4294901760, %v144_v37  ;;  %v164_v44 = vsub.f32 %v162_v32, %v163_v39  ;;  %v6703_v45 = vpack.c.bf16 %v183_v40, %v176_v38  ;;  %vm684_vm2 = vcmask 261120   ;;  %p7231_p8 = scmp.ne.s32.totalorder %s5872_s0, %s7230_s23  ;;  %p7236_p10 = scmp.lt.s32.totalorder %s7230_s23, %s7230_s23 }
  0x20   :  { %v155_v46 = vand.u32 4294901760, %v154_v41  ;;  %6183 = vmatprep.mubr.f32.mxu0 %v135_v42  ;;  %vm756_vm3 = vcmask 1041409   ;;  %vm7267_vm4 = vmmov 0   ;;  %vm1054_vm9 = vcmask 64512  }
  0x21   :  { %6184 = vmatmul.mubr.f32.vlgmr.msra.gmra.mrb[0].mxu0 %v145_v43  ;;  %6704 = vmatprep.subr.bf16.mxu0 %v6703_v45  ;;  %v165_v48 = vand.u32 4294901760, %v164_v44  ;;  %v1349_v44 = vld [vmem:[%s8646_s4] sm:$0xff]  ;;  %vm830_vm10 = vcmask 31744   ;;  %s7272_s4 = smov 12   ;;  %vm1056_vm11 = vcmask 97280   ;;  %vm1058_vm12 = vcmask 130048   ;;  %p7237_p11 = por %p7236_p10, %p7235_p9 }
  0x22   :  { %6706 = vmatpush3.bf16.msra.mxu0 %v6703_v45  ;;  %6186 = vmatprep.mubr.f32.mxu0 %v155_v46  ;;  %v8649_v45 = vmov 0.0   ;;  %v7486_v46 = vand.u32 4294901760, %v1349_v44  ;;  %vm1063_vm13 = vcmask 228352   ;;  %vm1061_vm14 = vcmask 195584  }
  0x23   :  { %6193 = vmatprep.subr.mxu0 %v190_v47  ;;  %6249 = vmatprep.subr.mxu1 %v8649_v45  ;;  %p7238_p12 = pnand %p7237_p11, %p7231_p8 }
  0x24   :  { %6251 = vmatprep.mubr.msk.f32.mxu1 %vm7267_vm4, %v8649_v45  ;;  %6250 = vmatpush3.msra.mxu1 %v7486_v46 }
  0x25   :  { %6187 = vmatmul.mubr.f32.gmra.mrb[2].mxu0 %v165_v48  ;;  %v1316_v48 = vld [vmem:[%s8643_s1 + $0x1] sm:$0x1]  ;;  %6254 = vmatprep.subr.mxu1 %v8649_v45 }
  0x26   :  { %6194 = vmatpush3.msra.mxu0 %v190_v47  ;;  %6195 = vmatprep.mubr.f32.mxu0 %v7358_v15  ;;  %v1315_v47 = vld [vmem:[%s8643_s1] sm:$0x1]  ;;  %vm1318_vm8 = vcmp.gt.f32.partialorder %v1316_v48, 20.0  ;;  %s7271_s1 = smov 4  }
  0x27   :  { %6708 = vmatprep.subr.bf16.mxu0 %v6707_v49  ;;  %vm1317_vm6 = vcmp.gt.f32.partialorder %v1315_v47, 20.0 }
  0x29   :  { %6196 = vmatmul.mubr.f32.vlgmr.msra.gmra.mrb[0].mxu0 %v7360_v16 }
  0x2a   :  { %6710 = vmatpush3.bf16.msra.mxu0 %v6707_v49  ;;  %6198 = vmatprep.mubr.f32.mxu0 %v7362_v19  ;;  %v1319_v49 = vmin.f32 %v1315_v47, 20.0 }
  0x2b   :  { %6205 = vmatprep.subr.mxu0 %v187_v21 }
  0x2c   :  { %v1321_v51 = vmul.f32 1.442695, %v1319_v49 }
  0x2d   :  { %6199 = vmatmul.mubr.f32.gmra.mrb[2].mxu0 %v7369_v25 }
  0x2e   :  { %6206 = vmatpush3.msra.mxu0 %v187_v21  ;;  %6207 = vmatprep.mubr.f32.mxu0 %v132_v22  ;;  %7138 = vpow2.f32 %v1321_v51 }
  0x2f   :  { %6712 = vmatprep.subr.bf16.mxu0 %v7356_v14 }
  0x31   :  { %6208 = vmatmul.mubr.f32.vlgmr.msra.gmra.mrb[0].mxu0 %v142_v23 }
  0x32   :  { %6714 = vmatpush3.bf16.msra.mxu0 %v7356_v14  ;;  %6210 = vmatprep.mubr.f32.mxu0 %v152_v27 }
  0x33   :  { %6217 = vmatprep.subr.mxu0 %v7348_v9 }
  0x35   :  { %6211 = vmatmul.mubr.f32.gmra.mrb[2].mxu0 %v162_v32 }
  0x36   :  { %6218 = vmatpush3.msra.mxu0 %v7348_v9  ;;  %6219 = vmatprep.mubr.f32.mxu0 %v133_v29 }
  0x37   :  { %6716 = vmatprep.subr.bf16.mxu0 %v6715_v50 }
  0x39   :  { %6220 = vmatmul.mubr.f32.vlgmr.msra.gmra.mrb[0].mxu0 %v143_v30 }
  0x3a   :  { %6718 = vmatpush3.bf16.msra.mxu0 %v6715_v50  ;;  %6222 = vmatprep.mubr.f32.mxu0 %v153_v34  ;;  %v1320_v50 = vmin.f32 %v1316_v48, 20.0 }
  0x3b   :  { %6229 = vmatprep.subr.mxu0 %v188_v28 }
  0x3d   :  { %6223 = vmatmul.mubr.f32.gmra.mrb[2].mxu0 %v163_v39 }
  0x3e   :  { %6230 = vmatpush3.msra.mxu0 %v188_v28  ;;  %6231 = vmatprep.mubr.f32.mxu0 %v7358_v15 }
  0x3f   :  { %6720 = vmatprep.subr.bf16.mxu0 %v7356_v14 }
  0x41   :  { %6232 = vmatmul.mubr.f32.vlgmr.msra.gmra.mrb[0].mxu0 %v7360_v16 }
  0x42   :  { %6722 = vmatpush3.bf16.msra.mxu0 %v7356_v14  ;;  %6234 = vmatprep.mubr.f32.mxu0 %v7362_v19 }
  0x43   :  { %6241 = vmatprep.subr.mxu0 %v7348_v9 }
  0x45   :  { %6235 = vmatmul.mubr.f32.gmra.mrb[2].mxu0 %v7369_v25 }
  0x46   :  { %6242 = vmatpush3.msra.mxu0 %v7348_v9  ;;  %6243 = vmatprep.mubr.f32.mxu0 %v7358_v15 }
  0x49   :  { %6244 = vmatmul.mubr.f32.vlgmr.msra.gmra.mrb[0].mxu0 %v7360_v16 }
  0x4a   :  { %6246 = vmatprep.mubr.f32.mxu0 %v7362_v19 }
  0x4d   :  { %6247 = vmatmul.mubr.f32.gmra.mrb[2].mxu0 %v7369_v25 }
 0x11c   :  { %v7408_v56 = vpop.f32.mrb[0].mxu0 }
 0x11d   :  { %8682 = vst [vmem:[#allocation9_spill] sm:$0xff] %v7408_v56  ;;  %v7411_v57 = vadd.f32 %v7408_v56, %v667_v55  ;;  %v7413_v58 = vpop.f32.mrb[1].mxu0 }
 0x11e   :  { %8683 = vst [vmem:[#allocation10_spill] sm:$0xff] %v7413_v58  ;;  %v7416_v59 = vadd.f32 %v667_v55, %v7413_v58 }
 0x11f   :  { %v686_v60 = vsel %vm684_vm2, %v7411_v57, 0.0  ;;  %v704_v61 = vmul.f32 %v7411_v57, %v7411_v57 }
 0x120   :  { %v685_v62 = vsel %vm684_vm2, %v7416_v59, 0.0  ;;  %v703_v63 = vmul.f32 %v7416_v59, %v7416_v59  ;;  %v7426_v0 = vpop.f32.mrb[2].mxu0 }
 0x121   :  { %8684 = vst [vmem:[#allocation11_spill] sm:$0xff] %v7426_v0  ;;  %v708_v1 = vsel %vm684_vm2, %v704_v61, 0.0  ;;  %v687_v2 = vadd.f32 %v686_v60, %v685_v62  ;;  %v7430_v3 = vadd.f32 %v7426_v0, %v667_v55  ;;  %v7432_v4 = vpop.f32.mrb[3].mxu0  ;;  %v7139_v60 = vpop.eup %7138 }
 0x122   :  { %8685 = vst [vmem:[#allocation12_spill] sm:$0xff] %v7432_v4  ;;  %v707_v5 = vsel %vm684_vm2, %v703_v63, 0.0  ;;  %v7436_v6 = vadd.f32 %v667_v55, %v7432_v4  ;;  %v1323_v55 = vmul.f32 1.442695, %v1320_v50  ;;  %v1325_v62 = vadd.f32 1.0, %v7139_v60 }
 0x123   :  { %v688_v7 = vrot.slane %v687_v2, 4  ;;  %v709_v8 = vadd.f32 %v708_v1, %v707_v5  ;;  %v695_v9 = vsel %vm684_vm2, %v7430_v3, 0.0  ;;  %v706_v10 = vmul.f32 %v7430_v3, %v7430_v3 }
 0x124   :  { %v694_v11 = vsel %vm684_vm2, %v7436_v6, 0.0  ;;  %v705_v12 = vmul.f32 %v7436_v6, %v7436_v6  ;;  %7140 = vpow2.f32 %v1323_v55  ;;  %v1328_v1 = vmul.f32 -0.5, %v7139_v60 }
 0x125   :  { %v689_v13 = vadd.f32 %v688_v7, %v687_v2  ;;  %v710_v14 = vrot.slane %v709_v8, 4  ;;  %v717_v15 = vsel %vm684_vm2, %v706_v10, 0.0  ;;  %v696_v16 = vadd.f32 %v695_v9, %v694_v11 }
 0x126   :  { %v716_v17 = vsel %vm684_vm2, %v705_v12, 0.0  ;;  %7142 = vlog2.f32 %v1325_v62  ;;  %v1329_v5 = vadd.f32 1.0, %v1328_v1  ;;  %v1331_v7 = vand.u32 2147483647, %v7139_v60 }
 0x127   :  { %v690_v18 = vrot.slane %v689_v13, 2  ;;  %v711_v19 = vadd.f32 %v710_v14, %v709_v8  ;;  %v697_v20 = vrot.slane %v696_v16, 4  ;;  %v718_v21 = vadd.f32 %v717_v15, %v716_v17 }
 0x128   :  { %v1330_v10 = vmul.f32 %v7139_v60, %v1329_v5  ;;  %vm1332_vm5 = vcmp.lt.f32.partialorder %v1331_v7, 0.0004427343  ;;  %v7269_v5 = vmov 1983009808  }
 0x129   :  { %v691_v22 = vadd.f32 %v690_v18, %v689_v13  ;;  %v712_v23 = vrot.slane %v711_v19, 2  ;;  %v698_v24 = vadd.f32 %v697_v20, %v696_v16  ;;  %v719_v25 = vrot.slane %v718_v21, 4 }
 0x12a   :  { %v7268_v20 = vmov 1966171168   ;;  %v782_v7 = vunpack.c.l.s4 %v7269_v5 }
 0x12b   :  { %v692_v26 = vrot.slane %v691_v22, 1  ;;  %v699_v27 = vrot.slane %v698_v24, 2  ;;  %v720_v28 = vadd.f32 %v719_v25, %v718_v21  ;;  %v713_v30 = vadd.f32 %v712_v23, %v711_v19 }
 0x12c   :  { %v1179_v21 = vunpack.c.l.s4 %v7268_v20 }
 0x12d   :  { %v693_v29 = vadd.f32 %v692_v26, %v691_v22  ;;  %v700_v31 = vadd.f32 %v699_v27, %v698_v24  ;;  %v721_v32 = vrot.slane %v720_v28, 2  ;;  %v714_v35 = vrot.slane %v713_v30, 1 }
 0x12e   :  { %v7141_v61 = vpop.eup %7140  ;;  %v1180_v22 = vunpack.c.0.s8 %v1179_v21 }
 0x12f   :  { %v701_v33 = vrot.slane %v700_v31, 1  ;;  %v722_v34 = vadd.f32 %v721_v32, %v720_v28  ;;  %731 = vrot.lane.b32.xlu0 %v693_v29, %s7259_s24  ;;  %727 = vrot.lane.b32.xlu1 %v693_v29, %s7260_s25  ;;  %v715_v40 = vadd.f32 %v714_v35, %v713_v30  ;;  %v1334_v63 = vadd.f32 1.0, %v7141_v61 }
 0x130   :  { %v1337_v2 = vmul.f32 -0.5, %v7141_v61  ;;  %v1340_v9 = vand.u32 2147483647, %v7141_v61  ;;  %v7143_v11 = vpop.eup %7142  ;;  %v7499_v26 = vsub.s32 %v1180_v22, %v7396_v52  ;;  %v7270_v22 = vmov 1934713408  }
 0x131   :  { %v702_v36 = vadd.f32 %v701_v33, %v700_v31  ;;  %v723_v37 = vrot.slane %v722_v34, 1  ;;  %7144 = vlog2.f32 %v1334_v63  ;;  %v1327_v14 = vmul.f32 0.6931472, %v7143_v11 }
 0x132   :  { %v1338_v8 = vadd.f32 1.0, %v1337_v2  ;;  %vm1341_vm7 = vcmp.lt.f32.partialorder %v1340_v9, 0.0004427343  ;;  %8686 = vst [vmem:[#allocation13_spill] sm:$0xff] %v7499_v26 }
 0x133   :  { %v724_v38 = vadd.f32 %v723_v37, %v722_v34  ;;  %739 = vrot.lane.b32.xlu0 %v693_v29, %s7261_s26  ;;  %735 = vrot.lane.b32.xlu1 %v693_v29, %s7262_s27  ;;  %v755_v39 = vrot.slane %v702_v36, 7  ;;  %v1333_v16 = vsel %vm1332_vm5, %v1330_v10, %v1327_v14  ;;  %v783_v14 = vunpack.c.0.s8 %v782_v7 }
 0x134   :  { %v1339_v12 = vmul.f32 %v7141_v61, %v1338_v8  ;;  %v1343_v18 = vsel %vm1317_vm6, %v1315_v47, %v1333_v16 }
 0x135   :  { %v7453_v41 = vsel %vm756_vm3, %v755_v39, %v693_v29  ;;  %v869_v42 = vrot.slane %v724_v38, 7  ;;  %7146 = vtanh.f32 %v1343_v18 }
 0x137   :  { %747 = vrot.lane.b32.xlu0 %v693_v29, %s7263_s28  ;;  %743 = vrot.lane.b32.xlu1 %v693_v29, %s7264_s29  ;;  %v7458_v43 = vsel %vm756_vm3, %v869_v42, %v715_v40 }
 0x13b   :  { %845 = vrot.lane.b32.xlu0 %v715_v40, %s7259_s24  ;;  %751 = vrot.lane.b32.xlu1 %v693_v29, %s7265_s30  ;;  %v7145_v13 = vpop.eup %7144  ;;  %v1451_v29 = vsub.f32 %v1349_v44, %v7486_v46 }
 0x13c   :  { %v1336_v15 = vmul.f32 0.6931472, %v7145_v13 }
 0x13d   :  { %v1452_v33 = vand.u32 4294901760, %v1451_v29 }
 0x13e   :  { %v1342_v17 = vsel %vm1341_vm7, %v1339_v12, %v1336_v15 }
 0x13f   :  { %853 = vrot.lane.b32.xlu0 %v715_v40, %s7261_s26  ;;  %841 = vrot.lane.b32.xlu1 %v715_v40, %s7260_s25  ;;  %v1344_v19 = vsel %vm1318_vm8, %v1316_v48, %v1342_v17  ;;  %v7147_v23 = vpop.eup %7146 }
 0x140   :  { %7148 = vtanh.f32 %v1344_v19  ;;  %v1347_v25 = vmul.f32 %v7147_v23, %v1315_v47  ;;  %v814_v23 = vunpack.c.l.s4 %v7270_v22 }
 0x143   :  { %729 = vrot.lane.b32.xlu0 %v702_v36, %s7260_s25  ;;  %849 = vrot.lane.b32.xlu1 %v715_v40, %s7262_s27 }
 0x147   :  { %733 = vrot.lane.b32.xlu0 %v702_v36, %s7259_s24  ;;  %857 = vrot.lane.b32.xlu1 %v715_v40, %s7264_s29 }
 0x14a   :  { %v7149_v24 = vpop.eup %7148 }
 0x14b   :  { %745 = vrot.lane.b32.xlu0 %v702_v36, %s7264_s29  ;;  %737 = vrot.lane.b32.xlu1 %v702_v36, %s7262_s27  ;;  %v1348_v27 = vmul.f32 %v7149_v24, %v1316_v48 }
 0x14d   :  { %v1356_v28 = vcombine.low %v1347_v25, %v1348_v27  ;;  %v7535_v27 = vsub.s32 %v783_v14, %v7396_v52 }
 0x14f   :  { %753 = vrot.lane.b32.xlu0 %v702_v36, %s7265_s30  ;;  %741 = vrot.lane.b32.xlu1 %v702_v36, %s7261_s26  ;;  %v1363_v30 = vrot.slane %v1356_v28, %v7499_v26  ;;  %8687 = vst [vmem:[#allocation14_spill] sm:$0xff] %v7535_v27 }
 0x151   :  { %v1370_v31 = vrot.slane %v1363_v30, %v7499_v26 }
 0x153   :  { %843 = vrot.lane.b32.xlu0 %v724_v38, %s7260_s25  ;;  %749 = vrot.lane.b32.xlu1 %v702_v36, %s7263_s28  ;;  %v1371_v32 = vsel %vm1054_vm9, %v1370_v31, 0  ;;  %v1453_v36 = vsub.f32 %v1451_v29, %v1452_v33 }
 0x154   :  { %v7505_v34 = vand.u32 4294901760, %v1371_v32 }
 0x155   :  { %v1454_v42 = vand.u32 4294901760, %v1453_v36  ;;  %v815_v36 = vunpack.c.0.s8 %v814_v23 }
 0x156   :  { %v1440_v35 = vsub.f32 %v1371_v32, %v7505_v34 }
 0x157   :  { %851 = vrot.lane.b32.xlu0 %v724_v38, %s7262_s27  ;;  %847 = vrot.lane.b32.xlu1 %v724_v38, %s7259_s24 }
 0x158   :  { %v1441_v39 = vand.u32 4294901760, %v1440_v35 }
 0x15b   :  { %859 = vrot.lane.b32.xlu0 %v724_v38, %s7264_s29  ;;  %855 = vrot.lane.b32.xlu1 %v724_v38, %s7261_s26 }
 0x15f   :  { %867 = vrot.lane.b32.xlu0 %v724_v38, %s7265_s30  ;;  %863 = vrot.lane.b32.xlu1 %v724_v38, %s7263_s28 }
 0x163   :  { %861 = vrot.lane.b32.xlu0 %v715_v40, %s7263_s28  ;;  %865 = vrot.lane.b32.xlu1 %v715_v40, %s7265_s30  ;;  %v1442_v40 = vsub.f32 %v1440_v35, %v1441_v39 }
 0x165   :  { %v1443_v48 = vand.u32 4294901760, %v1442_v40 }
 0x167   :  { %6252 = vmatmul.mubr.f32.vlgmr.msra.gmra.mrb[0].mxu1 %v1443_v48 }
 0x168   :  { %6255 = vmatpush3.msra.mxu1 %v1454_v42  ;;  %6256 = vmatprep.mubr.msk.f32.mxu1 %vm7267_vm4, %v8649_v45 }
 0x169   :  { %6259 = vmatprep.subr.mxu1 %v8649_v45 }
 0x16f   :  { %6257 = vmatmul.mubr.f32.vlgmr.msra.gmra.mrb[0].mxu1 %v7505_v34 }
 0x170   :  { %6260 = vmatpush3.msra.mxu1 %v1451_v29  ;;  %6261 = vmatprep.mubr.msk.f32.mxu1 %vm7267_vm4, %v8649_v45 }
 0x171   :  { %6264 = vmatprep.subr.mxu1 %v8649_v45 }
 0x177   :  { %6262 = vmatmul.mubr.f32.vlgmr.msra.gmra.mrb[0].mxu1 %v1440_v35 }
 0x178   :  { %6265 = vmatpush3.msra.mxu1 %v7486_v46  ;;  %6266 = vmatprep.mubr.msk.f32.mxu1 %vm7267_vm4, %v8649_v45 }
 0x179   :  { %6269 = vmatprep.subr.mxu1 %v8649_v45 }
 0x17f   :  { %6267 = vmatmul.mubr.f32.vlgmr.msra.gmra.mrb[0].mxu1 %v1441_v39 }
 0x180   :  { %6270 = vmatpush3.msra.mxu1 %v1452_v33  ;;  %6271 = vmatprep.mubr.msk.f32.mxu1 %vm7267_vm4, %v8649_v45 }
 0x181   :  { %6274 = vmatprep.subr.mxu1 %v8649_v45 }
 0x187   :  { %6272 = vmatmul.mubr.f32.vlgmr.msra.gmra.mrb[0].mxu1 %v7505_v34 }
 0x188   :  { %6275 = vmatpush3.msra.mxu1 %v7486_v46  ;;  %6276 = vmatprep.mubr.msk.f32.mxu1 %vm7267_vm4, %v8649_v45 }
 0x18f   :  { %6277 = vmatmul.mubr.f32.vlgmr.msra.gmra.mrb[0].mxu1 %v7505_v34 }
 0x1a1   :  { %v732_v37 = vpop.permute.xlu0 %731  ;;  %v728_v38 = vpop.permute.xlu1 %727 }
 0x1a5   :  { %v740_v47 = vpop.permute.xlu0 %739  ;;  %v736_v44 = vpop.permute.xlu1 %735 }
 0x1a9   :  { %v748_v49 = vpop.permute.xlu0 %747  ;;  %v744_v50 = vpop.permute.xlu1 %743 }
 0x1ad   :  { %v7511_v51 = vpop.permute.xlu0 %845  ;;  %v752_v55 = vpop.permute.xlu1 %751 }
 0x1b1   :  { %v7516_v60 = vpop.permute.xlu0 %853  ;;  %v7518_v61 = vpop.permute.xlu1 %841 }
 0x1b5   :  { %v730_v62 = vpop.permute.xlu0 %729  ;;  %v850_v63 = vpop.permute.xlu1 %849 }
 0x1b6   :  { %v758_v10 = vrot.slane %v730_v62, 7 }
 0x1b8   :  { %v759_v17 = vsel %vm756_vm3, %v758_v10, %v728_v38 }
 0x1b9   :  { %v734_v1 = vpop.permute.xlu0 %733  ;;  %v7524_v2 = vpop.permute.xlu1 %857 }
 0x1ba   :  { %v760_v11 = vrot.slane %v734_v1, 7 }
 0x1bc   :  { %v761_v18 = vsel %vm756_vm3, %v760_v11, %v732_v37 }
 0x1bd   :  { %v746_v8 = vpop.permute.xlu0 %745  ;;  %v738_v9 = vpop.permute.xlu1 %737  ;;  %v780_v28 = vcombine.low %v7453_v41, %v761_v18 }
 0x1be   :  { %v762_v12 = vrot.slane %v738_v9, 7  ;;  %v766_v19 = vrot.slane %v746_v8, 7 }
 0x1bf   :  { %v787_v41 = vrot.slane %v780_v28, %v7535_v27 }
 0x1c0   :  { %v763_v13 = vsel %vm756_vm3, %v762_v12, %v736_v44  ;;  %v767_v31 = vsel %vm756_vm3, %v766_v19, %v744_v50 }
 0x1c1   :  { %v754_v15 = vpop.permute.xlu0 %753  ;;  %v742_v16 = vpop.permute.xlu1 %741  ;;  %v788_v21 = vcombine.low %v759_v17, %v763_v13 }
 0x1c2   :  { %v770_v20 = vrot.slane %v754_v15, 7  ;;  %v764_v25 = vrot.slane %v742_v16, 7 }
 0x1c3   :  { %v795_v33 = vrot.slane %v788_v21, %v7535_v27 }
 0x1c4   :  { %v771_v24 = vsel %vm756_vm3, %v770_v20, %v752_v55  ;;  %v765_v37 = vsel %vm756_vm3, %v764_v25, %v740_v47  ;;  %v7550_v47 = vsub.s32 %v815_v36, %v7396_v52 }
 0x1c5   :  { %v844_v29 = vpop.permute.xlu0 %843  ;;  %v750_v30 = vpop.permute.xlu1 %749  ;;  %v804_v35 = vcombine.low %v767_v31, %v771_v24  ;;  %v812_v62 = vcombine.low %v787_v41, %v795_v33 }
 0x1c6   :  { %v768_v32 = vrot.slane %v750_v30, 7  ;;  %8688 = vst [vmem:[#allocation15_spill] sm:$0xff] %v7550_v47 }
 0x1c7   :  { %v811_v50 = vrot.slane %v804_v35, %v7535_v27  ;;  %v819_v9 = vrot.slane %v812_v62, %v7550_v47 }
 0x1c8   :  { %v769_v38 = vsel %vm756_vm3, %v768_v32, %v748_v49  ;;  %v871_v49 = vrot.slane %v844_v29, 7 }
 0x1c9   :  { %v796_v39 = vcombine.low %v765_v37, %v769_v38  ;;  %v852_v40 = vpop.permute.xlu0 %851  ;;  %v848_v42 = vpop.permute.xlu1 %847 }
 0x1ca   :  { %v875_v44 = vrot.slane %v852_v40, 7  ;;  %v873_v48 = vrot.slane %v848_v42, 7  ;;  %v872_v11 = vsel %vm756_vm3, %v871_v49, %v7518_v61 }
 0x1cb   :  { %v803_v55 = vrot.slane %v796_v39, %v7535_v27 }
 0x1cc   :  { %v876_v7 = vsel %vm756_vm3, %v875_v44, %v850_v63  ;;  %v874_v8 = vsel %vm756_vm3, %v873_v48, %v7511_v51 }
 0x1cd   :  { %v860_v46 = vpop.permute.xlu0 %859  ;;  %v856_v1 = vpop.permute.xlu1 %855  ;;  %v820_v5 = vcombine.low %v803_v55, %v811_v50  ;;  %v901_v12 = vcombine.low %v872_v11, %v876_v7  ;;  %v893_v13 = vcombine.low %v7458_v43, %v874_v8 }
 0x1ce   :  { %v879_v17 = vrot.slane %v860_v46, 7  ;;  %v877_v18 = vrot.slane %v856_v1, 7 }
 0x1cf   :  { %v827_v10 = vrot.slane %v820_v5, %v7550_v47  ;;  %v908_v34 = vrot.slane %v901_v12, %v7535_v27  ;;  %v900_v61 = vrot.slane %v893_v13, %v7535_v27 }
 0x1d0   :  { %v878_v23 = vsel %vm756_vm3, %v877_v18, %v7516_v60  ;;  %v880_v25 = vsel %vm756_vm3, %v879_v17, %v7524_v2 }
 0x1d1   :  { %v868_v14 = vpop.permute.xlu0 %867  ;;  %v864_v15 = vpop.permute.xlu1 %863  ;;  %v829_v16 = vcombine.high %v819_v9, %v827_v10  ;;  %v828_v63 = vcombine.low %v819_v9, %v827_v10  ;;  %v925_v33 = vcombine.low %v900_v61, %v908_v34 }
 0x1d2   :  { %v883_v20 = vrot.slane %v868_v14, 7  ;;  %v881_v21 = vrot.slane %v864_v15, 7 }
 0x1d3   :  { %v834_v51 = vsel %vm830_vm10, %v829_v16, 0.0  ;;  %v831_v19 = vsel %vm830_vm10, %v828_v63, 0.0  ;;  %v932_v36 = vrot.slane %v925_v33, %v7550_v47 }
 0x1d4   :  { %835 = vadd.xlane.f32.xlu1 %v834_v51  ;;  %832 = vadd.xlane.f32.xlu0 %v831_v19 }
 0x1d5   :  { %v862_v22 = vpop.permute.xlu0 %861  ;;  %v866_v43 = vpop.permute.xlu1 %865 }
 0x1d6   :  { %v882_v24 = vsel %vm756_vm3, %v881_v21, %v862_v22  ;;  %v884_v28 = vsel %vm756_vm3, %v883_v20, %v866_v43 }
 0x1d7   :  { %v909_v29 = vcombine.low %v878_v23, %v882_v24  ;;  %v917_v30 = vcombine.low %v880_v25, %v884_v28 }
 0x1d9   :  { %v916_v31 = vrot.slane %v909_v29, %v7535_v27  ;;  %v924_v32 = vrot.slane %v917_v30, %v7535_v27 }
 0x1db   :  { %v933_v35 = vcombine.low %v916_v31, %v924_v32 }
 0x1dd   :  { %v940_v37 = vrot.slane %v933_v35, %v7550_v47 }
 0x1df   :  { %v941_v60 = vcombine.low %v932_v36, %v940_v37  ;;  %v942_v41 = vcombine.high %v932_v36, %v940_v37 }
 0x1e1   :  { %v943_v38 = vsel %vm830_vm10, %v941_v60, 0.0  ;;  %v946_v2 = vsel %vm830_vm10, %v942_v41, 0.0 }
 0x1e2   :  { %944 = vadd.xlane.f32.xlu0 %v943_v38 }
 0x1e6   :  { %947 = vadd.xlane.f32.xlu0 %v946_v2 }
 0x261   :  { %v836_v39 = vpop.xlane.xlu1 %835  ;;  %v833_v40 = vpop.xlane.xlu0 %832 }
 0x262   :  { %v838_v42 = vmul.f32 0.015625, %v836_v39  ;;  %v837_v44 = vmul.f32 0.015625, %v833_v40 }
 0x264   :  { %v974_v48 = vcombine.high %v838_v42, %v8649_v45  ;;  %v981_v50 = vrot.slane %v838_v42, %v7535_v27  ;;  %v959_v55 = vcombine.high %v837_v44, %v8649_v45  ;;  %v966_v62 = vrot.slane %v837_v44, %v7535_v27 }
 0x265   :  { %v951_v13 = vmul.f32 %v837_v44, %v837_v44  ;;  %v952_v18 = vmul.f32 %v838_v42, %v838_v42  ;;  %v7624_v44 = vpop.f32.mrb[0].mxu1 }
 0x266   :  { %v989_v49 = vcombine.low %v966_v62, %v981_v50  ;;  %v990_v46 = vcombine.high %v966_v62, %v981_v50  ;;  %v988_v1 = vrot.slane %v974_v48, %v7535_v27  ;;  %v973_v5 = vrot.slane %v959_v55, %v7535_v27  ;;  %v6278_v48 = vpop.f32.mrb[1].mxu1  ;;  %v3243_v50 = vld [vmem:[#allocation2 + $0x40] sm:$0xff]  ;;  %v3244_v55 = vld [vmem:[#allocation2 + $0x48] sm:$0xff] }
 0x267   :  { %v3256_v62 = vand.u32 4294901760, %v3243_v50 }
 0x268   :  { %v1004_v7 = vrot.slane %v990_v46, %v7550_v47  ;;  %v7585_v8 = vrot.slane %v989_v49, %v7550_v47  ;;  %v1005_v11 = vcombine.low %v973_v5, %v988_v1  ;;  %v1006_v33 = vcombine.high %v973_v5, %v988_v1  ;;  %v3245_v5 = vld [vmem:[#allocation2 + $0x50] sm:$0xff] }
 0x269   :  { %v3259_v49 = vand.u32 4294901760, %v3244_v55  ;;  %v3366_v46 = vsub.f32 %v3243_v50, %v3256_v62 }
 0x26a   :  { %1030 = vrot.lane.b32.xlu0 %v1004_v7, %s7258_s8  ;;  %v1021_v9 = vcombine.high %v7585_v8, %v8649_v45  ;;  %v1022_v10 = vcombine.high %v1004_v7, %v8649_v45  ;;  %v1013_v15 = vrot.slane %v1005_v11, %v7550_v47  ;;  %v1020_v60 = vrot.slane %v1006_v33, %v7550_v47  ;;  %v3246_v7 = vld [vmem:[#allocation2 + $0x58] sm:$0xff] }
 0x26b   :  { %v3373_v1 = vsub.f32 %v3244_v55, %v3259_v49  ;;  %v3262_v11 = vand.u32 4294901760, %v3245_v5 }
 0x26c   :  { %1026 = vrot.lane.b32.xlu1 %v1021_v9, %s7271_s1  ;;  %v1023_v32 = vcombine.high %v1013_v15, %v8649_v45  ;;  %v1024_v42 = vcombine.high %v1020_v60, %v8649_v45  ;;  %v3367_v9 = vand.u32 4294901760, %v3366_v46 }
 0x26e   :  { %1034 = vrot.lane.b32.xlu0 %v1022_v10, %s7272_s4  ;;  %v3374_v10 = vand.u32 4294901760, %v3373_v1 }
 0x26f   :  { %v945_v12 = vpop.xlane.xlu0 %944 }
 0x270   :  { %v949_v14 = vmul.f32 0.015625, %v945_v12  ;;  %v3265_v12 = vand.u32 4294901760, %v3246_v7 }
 0x272   :  { %v953_v16 = vsub.f32 %v949_v14, %v951_v13  ;;  %1038 = vrot.lane.b32.xlu0 %v1013_v15, %s7273_s15  ;;  %v3368_v13 = vsub.f32 %v3366_v46, %v3367_v9  ;;  %v3375_v14 = vsub.f32 %v3373_v1, %v3374_v10  ;;  %v3380_v15 = vsub.f32 %v3245_v5, %v3262_v11 }
 0x273   :  { %v948_v63 = vpop.xlane.xlu0 %947 }
 0x274   :  { %v955_v17 = vadd.f32 1e-05, %v953_v16  ;;  %v950_v51 = vmul.f32 0.015625, %v948_v63  ;;  %v3387_v16 = vsub.f32 %v3246_v7, %v3265_v12  ;;  %v3369_v63 = vand.u32 4294901760, %v3368_v13 }
 0x275   :  { %v7647_v7 = vpack.c.bf16 %v3374_v10, %v3367_v9 }
 0x276   :  { %v954_v19 = vsub.f32 %v950_v51, %v952_v18  ;;  %7150 = vrsqrt.f32 %v955_v17  ;;  %v3376_v17 = vand.u32 4294901760, %v3375_v14  ;;  %v3381_v18 = vand.u32 4294901760, %v3380_v15 }
 0x277   :  { %v3388_v51 = vand.u32 4294901760, %v3387_v16 }
 0x278   :  { %v956_v20 = vadd.f32 1e-05, %v954_v19  ;;  %v6827_v19 = vpack.c.bf16 %v3376_v17, %v3369_v63 }
 0x27a   :  { %7152 = vrsqrt.f32 %v956_v20  ;;  %v3382_v20 = vsub.f32 %v3380_v15, %v3381_v18  ;;  %6828 = vmatprep.subr.bf16.mxu1 %v6827_v19 }
 0x27b   :  { %6830 = vmatpush3.bf16.msra.mxu1 %v6827_v19 }
 0x280   :  { %v7151_v21 = vpop.eup %7150 }
 0x281   :  { %v1072_v61 = vrot.slane %v7151_v21, %v7535_v27  ;;  %v1065_v29 = vcombine.high %v7151_v21, %v8649_v45  ;;  %v3389_v21 = vsub.f32 %v3387_v16, %v3388_v51 }
 0x283   :  { %v1079_v35 = vrot.slane %v1065_v29, %v7535_v27  ;;  %v1986_v29 = vld [vmem:[#allocation2 + $0x20] sm:$0xff] }
 0x284   :  { %v7153_v34 = vpop.eup %7152 }
 0x285   :  { %v1087_v22 = vrot.slane %v7153_v34, %v7535_v27  ;;  %v1080_v24 = vcombine.high %v7153_v34, %v8649_v45  ;;  %v3383_v34 = vand.u32 4294901760, %v3382_v20 }
 0x287   :  { %v1096_v43 = vcombine.high %v1072_v61, %v1087_v22  ;;  %v1095_v23 = vcombine.low %v1072_v61, %v1087_v22  ;;  %v1094_v31 = vrot.slane %v1080_v24, %v7535_v27  ;;  %v3390_v61 = vand.u32 4294901760, %v3389_v21 }
 0x288   :  { %v7631_v24 = vpack.c.bf16 %v3373_v1, %v3366_v46 }
 0x289   :  { %v1110_v25 = vrot.slane %v1096_v43, %v7550_v47  ;;  %v7600_v28 = vrot.slane %v1095_v23, %v7550_v47  ;;  %v1111_v37 = vcombine.low %v1079_v35, %v1094_v31  ;;  %v1112_v41 = vcombine.high %v1079_v35, %v1094_v31 }
 0x28a   :  { %v6831_v22 = vpack.c.bf16 %v3390_v61, %v3383_v34  ;;  %v7627_v43 = vpack.c.bf16 %v3259_v49, %v3256_v62  ;;  %v7629_v23 = vpack.c.bf16 %v3265_v12, %v3262_v11  ;;  %v2003_v31 = vand.u32 4294901760, %v1986_v29 }
 0x28b   :  { %1136 = vrot.lane.b32.xlu0 %v1110_v25, %s7258_s8  ;;  %v1127_v30 = vcombine.high %v7600_v28, %v8649_v45  ;;  %v1128_v36 = vcombine.high %v1110_v25, %v8649_v45  ;;  %v1119_v38 = vrot.slane %v1111_v37, %v7550_v47  ;;  %v1126_v2 = vrot.slane %v1112_v41, %v7550_v47  ;;  %v1988_v37 = vld [vmem:[#allocation2 + $0x30] sm:$0xff] }
 0x28c   :  { %6832 = vmatprep.subr.bf16.mxu1 %v6831_v22  ;;  %v7634_v25 = vpack.c.bf16 %v3387_v16, %v3380_v15  ;;  %v2113_v35 = vsub.f32 %v1986_v29, %v2003_v31  ;;  %v7651_v16 = vpack.c.bf16 %v3388_v51, %v3381_v18 }
 0x28d   :  { %1132 = vrot.lane.b32.xlu1 %v1127_v30, %s7271_s1  ;;  %v1129_v39 = vcombine.high %v1119_v38, %v8649_v45  ;;  %v1130_v40 = vcombine.high %v1126_v2, %v8649_v45  ;;  %6834 = vmatpush3.bf16.msra.mxu1 %v6831_v22  ;;  %v1987_v30 = vld [vmem:[#allocation2 + $0x28] sm:$0xff] }
 0x28e   :  { %6836 = vmatprep.subr.bf16.mxu1 %v7631_v24 }
 0x28f   :  { %1042 = vrot.lane.b32.xlu0 %v1023_v32, %s7274_s16  ;;  %v2006_v32 = vand.u32 4294901760, %v1987_v30 }
 0x291   :  { %1140 = vrot.lane.b32.xlu1 %v1128_v36, %s7272_s4  ;;  %v7636_v33 = vpack.c.bf16 %v2006_v32, %v2003_v31  ;;  %v2120_v36 = vsub.f32 %v1987_v30, %v2006_v32  ;;  %v1168_v32 = vsub.s32 1, %v7396_v52 }
 0x293   :  { %1046 = vrot.lane.b32.xlu0 %v1020_v60, %s7275_s3  ;;  %v1989_v60 = vld [vmem:[#allocation2 + $0x38] sm:$0xff]  ;;  %6724 = vmatprep.subr.bf16.mxu0 %v7636_v33  ;;  %v7653_v63 = vpack.c.bf16 %v2120_v36, %v2113_v35 }
 0x294   :  { %v2012_v41 = vand.u32 4294901760, %v1989_v60  ;;  %6726 = vmatpush3.bf16.msra.mxu0 %v7636_v33 }
 0x295   :  { %1144 = vrot.lane.b32.xlu1 %v1119_v38, %s7273_s15  ;;  %v2009_v38 = vand.u32 4294901760, %v1988_v37 }
 0x296   :  { %v2134_v49 = vsub.f32 %v1989_v60, %v2012_v41 }
 0x297   :  { %v2127_v62 = vsub.f32 %v1988_v37, %v2009_v38 }
 0x298   :  { %v2135_v5 = vand.u32 4294901760, %v2134_v49 }
 0x299   :  { %1152 = vrot.lane.b32.xlu1 %v1126_v2, %s7275_s3  ;;  %v2114_v2 = vand.u32 4294901760, %v2113_v35  ;;  %v2128_v1 = vand.u32 4294901760, %v2127_v62  ;;  %v7655_v17 = vpack.c.bf16 %v2134_v49, %v2127_v62 }
 0x29a   :  { %v2136_v12 = vsub.f32 %v2134_v49, %v2135_v5 }
 0x29b   :  { %v2129_v11 = vsub.f32 %v2127_v62, %v2128_v1  ;;  %v7659_v22 = vpack.c.bf16 %v2135_v5, %v2128_v1 }
 0x29c   :  { %v2137_v14 = vand.u32 4294901760, %v2136_v12 }
 0x29d   :  { %1148 = vrot.lane.b32.xlu1 %v1129_v39, %s7274_s16  ;;  %v2121_v39 = vand.u32 4294901760, %v2120_v36  ;;  %v2130_v13 = vand.u32 4294901760, %v2129_v11 }
 0x29f   :  { %v2122_v48 = vsub.f32 %v2120_v36, %v2121_v39  ;;  %v7649_v15 = vpack.c.bf16 %v2137_v14, %v2130_v13  ;;  %v7657_v61 = vpack.c.bf16 %v2121_v39, %v2114_v2 }
 0x2a1   :  { %1156 = vrot.lane.b32.xlu1 %v1130_v40, %s7276_s17  ;;  %v7640_v40 = vpack.c.bf16 %v2012_v41, %v2009_v38  ;;  %v2123_v55 = vand.u32 4294901760, %v2122_v48 }
 0x2a3   :  { %6728 = vmatprep.subr.bf16.mxu0 %v7640_v40 }
 0x2a4   :  { %6730 = vmatpush3.bf16.msra.mxu0 %v7640_v40 }
 0x2a5   :  { %1050 = vrot.lane.b32.xlu1 %v1024_v42, %s7276_s17  ;;  %v2115_v42 = vsub.f32 %v2113_v35, %v2114_v2  ;;  %v1169_v2 = vrot.slane %v7404_v54, %v1168_v32 }
 0x2a7   :  { %v2116_v50 = vand.u32 4294901760, %v2115_v42 }
 0x2a9   :  { %v7644_v46 = vpack.c.bf16 %v2123_v55, %v2116_v50 }
 0x2ab   :  { %6732 = vmatprep.subr.bf16.mxu0 %v7644_v46 }
 0x2dc   :  { %v1031_v19 = vpop.permute.xlu0 %1030 }
 0x2de   :  { %v1027_v20 = vpop.permute.xlu1 %1026 }
 0x2df   :  { %v1053_v35 = vsel %vm830_vm10, %v7585_v8, %v1027_v20  ;;  %v1174_v8 = vsub.s32 2, %v7396_v52 }
 0x2e0   :  { %v1035_v21 = vpop.permute.xlu0 %1034 }
 0x2e1   :  { %v1175_v12 = vrot.slane %v7404_v54, %v1174_v8 }
 0x2e4   :  { %v1039_v10 = vpop.permute.xlu0 %1038 }
 0x2fd   :  { %v1137_v30 = vpop.permute.xlu0 %1136 }
 0x2ff   :  { %v1133_v34 = vpop.permute.xlu1 %1132 }
 0x300   :  { %v1159_v18 = vsel %vm830_vm10, %v7600_v28, %v1133_v34  ;;  %v1055_v28 = vsel %vm1054_vm9, %v1053_v35, %v1031_v19 }
 0x301   :  { %v1160_v31 = vsel %vm1054_vm9, %v1159_v18, %v1137_v30  ;;  %v1043_v36 = vpop.permute.xlu0 %1042  ;;  %v1057_v48 = vsel %vm1056_vm11, %v1055_v28, %v1035_v21 }
 0x302   :  { %v1059_v62 = vsel %vm1058_vm12, %v1057_v48, %v1039_v10 }
 0x303   :  { %v1141_v9 = vpop.permute.xlu1 %1140  ;;  %v1060_v1 = vsel %vm46_vm1, %v1059_v62, %v1043_v36 }
 0x304   :  { %v1161_v37 = vsel %vm1056_vm11, %v1160_v31, %v1141_v9 }
 0x305   :  { %v1047_v50 = vpop.permute.xlu0 %1046 }
 0x306   :  { %v1062_v5 = vsel %vm1061_vm14, %v1060_v1, %v1047_v50 }
 0x307   :  { %v1145_v29 = vpop.permute.xlu1 %1144 }
 0x308   :  { %v1162_v60 = vsel %vm1058_vm12, %v1161_v37, %v1145_v29 }
 0x30b   :  { %v1153_v51 = vpop.permute.xlu1 %1152 }
 0x30f   :  { %v1149_v38 = vpop.permute.xlu1 %1148 }
 0x310   :  { %v1163_v41 = vsel %vm46_vm1, %v1162_v60, %v1149_v38 }
 0x311   :  { %v1164_v42 = vsel %vm1061_vm14, %v1163_v41, %v1153_v51 }
 0x313   :  { %v1157_v39 = vpop.permute.xlu1 %1156 }
 0x314   :  { %v1165_v55 = vsel %vm1063_vm13, %v1164_v42, %v1157_v39 }
 0x315   :  { %v1170_v49 = vmul.f32 %v1169_v2, %v1165_v55 }
 0x317   :  { %v1184_v11 = vrot.slane %v1170_v49, %v7499_v26  ;;  %v1051_v13 = vpop.permute.xlu1 %1050 }
 0x318   :  { %v1064_v14 = vsel %vm1063_vm13, %v1062_v5, %v1051_v13  ;;  %v1352_v13 = vsub.s32 6, %v7396_v52 }
 0x319   :  { %v1185_v19 = vcombine.high %v1184_v11, %v1184_v11  ;;  %v1192_v20 = vrot.slane %v1184_v11, %v7499_v26  ;;  %v1171_v21 = vmul.f32 %v1170_v49, %v1064_v14 }
 0x31b   :  { %v1199_v34 = vrot.slane %v1185_v19, %v7499_v26  ;;  %v1176_v9 = vsub.f32 %v1175_v12, %v1171_v21  ;;  %v1203_v10 = vrot.slane %v1192_v20, %v7399_v53 }
 0x31d   :  { %v1221_v29 = vrot.slane %v1176_v9, %v7499_v26  ;;  %v1207_v30 = vrot.slane %v1199_v34, %v7399_v53  ;;  %v1210_v54 = vmul.f32 %v1203_v10, %v7416_v59  ;;  %v1211_v31 = vmul.f32 %v1203_v10, %v7411_v57  ;;  %v7206_v34 = vld [vmem:[%s8647_s5] sm:$0xff] }
 0x31e   :  { %v1353_v9 = vrot.slane %v7206_v34, %v1352_v13  ;;  %v8657_v34 = vand.u32 15, %v7396_v52 }
 0x31f   :  { %v1222_v18 = vcombine.high %v1221_v29, %v1221_v29  ;;  %v1229_v51 = vrot.slane %v1221_v29, %v7499_v26  ;;  %v1212_v36 = vmul.f32 %v1207_v30, %v7436_v6  ;;  %v1213_v37 = vmul.f32 %v1207_v30, %v7430_v3 }
 0x321   :  { %v1236_v32 = vrot.slane %v1222_v18, %v7499_v26  ;;  %v1240_v35 = vrot.slane %v1229_v51, %v7399_v53 }
 0x323   :  { %v1244_v60 = vrot.slane %v1236_v32, %v7399_v53  ;;  %v7695_v38 = vadd.f32 %v1240_v35, %v1210_v54  ;;  %v7697_v41 = vadd.f32 %v1240_v35, %v1211_v31  ;;  %v6967_v35 = vadd.f32 %v7624_v44, %v1353_v9 }
 0x325   :  { %v7699_v28 = vadd.f32 %v1244_v60, %v1212_v36  ;;  %v7701_v2 = vadd.f32 %v1244_v60, %v1213_v37  ;;  %v1255_v57 = vmin.f32 %v7695_v38, 20.0  ;;  %v1256_v59 = vmin.f32 %v7697_v41, 20.0 }
 0x326   :  { %vm1251_vm15 = vcmp.gt.f32.partialorder %v7695_v38, 20.0  ;;  %vm1252_vm0 = vcmp.gt.f32.partialorder %v7697_v41, 20.0 }
 0x327   :  { %v1257_v39 = vmin.f32 %v7699_v28, 20.0  ;;  %v1258_v6 = vmin.f32 %v7701_v2, 20.0  ;;  %v1259_v42 = vmul.f32 1.442695, %v1255_v57  ;;  %v1261_v3 = vmul.f32 1.442695, %v1256_v59 }
 0x328   :  { %vm1253_vm4 = vcmp.gt.f32.partialorder %v7699_v28, 20.0 }
 0x329   :  { %v1263_v8 = vmul.f32 1.442695, %v1257_v39  ;;  %v1265_v48 = vmul.f32 1.442695, %v1258_v6  ;;  %7154 = vpow2.f32 %v1259_v42 }
 0x32a   :  { %7156 = vpow2.f32 %v1261_v3 }
 0x32b   :  { %7158 = vpow2.f32 %v1263_v8 }
 0x32c   :  { %7160 = vpow2.f32 %v1265_v48 }
 0x333   :  { %v7155_v50 = vpop.eup %7154 }
 0x334   :  { %v7157_v55 = vpop.eup %7156  ;;  %v1267_v62 = vadd.f32 1.0, %v7155_v50  ;;  %v1270_v14 = vmul.f32 -0.5, %v7155_v50  ;;  %v1273_v29 = vand.u32 2147483647, %v7155_v50 }
 0x335   :  { %v7159_v49 = vpop.eup %7158  ;;  %v1276_v1 = vadd.f32 1.0, %v7157_v55  ;;  %v1279_v19 = vmul.f32 -0.5, %v7157_v55  ;;  %v1282_v18 = vand.u32 2147483647, %v7157_v55 }
 0x336   :  { %v7161_v5 = vpop.eup %7160  ;;  %7162 = vlog2.f32 %v1267_v62  ;;  %v1285_v11 = vadd.f32 1.0, %v7159_v49  ;;  %v1288_v20 = vmul.f32 -0.5, %v7159_v49  ;;  %v1271_v10 = vadd.f32 1.0, %v1270_v14 }
 0x337   :  { %7164 = vlog2.f32 %v1276_v1  ;;  %v1294_v12 = vadd.f32 1.0, %v7161_v5  ;;  %v1297_v21 = vmul.f32 -0.5, %v7161_v5  ;;  %v1280_v30 = vadd.f32 1.0, %v1279_v19 }
 0x338   :  { %7166 = vlog2.f32 %v1285_v11  ;;  %v1289_v51 = vadd.f32 1.0, %v1288_v20  ;;  %v1291_v31 = vand.u32 2147483647, %v7159_v49  ;;  %v1272_v60 = vmul.f32 %v7155_v50, %v1271_v10 }
 0x339   :  { %7168 = vlog2.f32 %v1294_v12  ;;  %v1298_v32 = vadd.f32 1.0, %v1297_v21  ;;  %vm1274_vm5 = vcmp.lt.f32.partialorder %v1273_v29, 0.0004427343  ;;  %v1281_v39 = vmul.f32 %v7157_v55, %v1280_v30 }
 0x33a   :  { %v1300_v6 = vand.u32 2147483647, %v7161_v5  ;;  %vm1283_vm6 = vcmp.lt.f32.partialorder %v1282_v18, 0.0004427343  ;;  %v1290_v8 = vmul.f32 %v7159_v49, %v1289_v51  ;;  %vm1292_vm7 = vcmp.lt.f32.partialorder %v1291_v31, 0.0004427343 }
 0x33b   :  { %v1299_v44 = vmul.f32 %v7161_v5, %v1298_v32  ;;  %v1826_v49 = vrot.slane %v6967_v35, %v7499_v26  ;;  %v7728_v19 = vadd.s32 16, %v7396_v52 }
 0x33c   :  { %vm1301_vm8 = vcmp.lt.f32.partialorder %v1300_v6, 0.0004427343 }
 0x33d   :  { %v1827_v14 = vcombine.high %v1826_v49, %v1826_v49  ;;  %v1834_v20 = vrot.slane %v1826_v49, %v7499_v26  ;;  %v8655_v10 = vand.u32 15, %v7728_v19 }
 0x33f   :  { %v1841_v21 = vrot.slane %v1827_v14, %v7499_v26  ;;  %v1845_v18 = vrot.slane %v1834_v20, %v7399_v53 }
 0x340   :  { %v7163_v54 = vpop.eup %7162 }
 0x341   :  { %v7165_v36 = vpop.eup %7164  ;;  %v1269_v37 = vmul.f32 0.6931472, %v7163_v54  ;;  %v1849_v32 = vrot.slane %v1841_v21, %v7399_v53 }
 0x342   :  { %v7167_v57 = vpop.eup %7166  ;;  %v1278_v59 = vmul.f32 0.6931472, %v7165_v36  ;;  %v1965_v36 = vadd.s32 4294967295, %v8657_v34 }
 0x343   :  { %v1275_v42 = vsel %vm1274_vm5, %v1272_v60, %v1269_v37  ;;  %v1287_v3 = vmul.f32 0.6931472, %v7167_v57  ;;  %v7169_v48 = vpop.eup %7168  ;;  %vm1254_vm5 = vcmp.gt.f32.partialorder %v7701_v2, 20.0 }
 0x344   :  { %v1284_v62 = vsel %vm1283_vm6, %v1281_v39, %v1278_v59  ;;  %v1303_v1 = vsel %vm1251_vm15, %v7695_v38, %v1275_v42  ;;  %v1296_v12 = vmul.f32 0.6931472, %v7169_v48  ;;  %vm1953_vm15 = vcmask 1040384  }
 0x345   :  { %v1293_v11 = vsel %vm1292_vm7, %v1290_v8, %v1287_v3  ;;  %v1304_v50 = vsel %vm1252_vm0, %v7697_v41, %v1284_v62  ;;  %7170 = vtanh.f32 %v1303_v1  ;;  %vm1969_vm0 = vcmp.ge.s32.totalorder %v1965_v36, 0 }
 0x346   :  { %v1305_v55 = vsel %vm1253_vm4, %v7699_v28, %v1293_v11  ;;  %7172 = vtanh.f32 %v1304_v50  ;;  %v1302_v5 = vsel %vm1301_vm8, %v1299_v44, %v1296_v12  ;;  %v7774_v12 = vadd.s32 8, %v7396_v52 }
 0x347   :  { %7174 = vtanh.f32 %v1305_v55  ;;  %v1306_v13 = vsel %vm1254_vm5, %v7701_v2, %v1302_v5  ;;  %vm3873_vm6 = vcmask 1046528   ;;  %vm4542_vm5 = vcmask 1045504  }
 0x348   :  { %7176 = vtanh.f32 %v1306_v13 }
 0x34f   :  { %v7171_v9 = vpop.eup %7170 }
 0x350   :  { %v7173_v29 = vpop.eup %7172  ;;  %v1311_v30 = vmul.f32 %v7171_v9, %v7695_v38  ;;  %v1967_v38 = vadd.s32 4294967295, %v8655_v10 }
 0x351   :  { %v7175_v51 = vpop.eup %7174  ;;  %v1312_v54 = vmul.f32 %v7173_v29, %v7697_v41 }
 0x352   :  { %v1313_v31 = vmul.f32 %v7175_v51, %v7699_v28  ;;  %v7739_v35 = vadd.f32 %v1845_v18, %v1311_v30  ;;  %v7177_v37 = vpop.eup %7176  ;;  %vm1971_vm4 = vcmp.ge.s32.totalorder %v1967_v38, 0 }
 0x353   :  { %v7743_v60 = vadd.f32 %v1845_v18, %v1312_v54  ;;  %v1314_v57 = vmul.f32 %v7177_v37, %v7701_v2  ;;  %v8651_v18 = vand.u32 15, %v7774_v12 }
 0x354   :  { %v7748_v59 = vadd.f32 %v1849_v32, %v1313_v31  ;;  %v3247_v41 = vsel %vm684_vm2, %v7739_v35, 0  ;;  %v1954_v28 = vrot.slane %v7739_v35, 7  ;;  %v7805_v31 = vadd.s32 24, %v7396_v52 }
 0x355   :  { %v1955_v39 = vrot.slane %v7743_v60, 7  ;;  %v7754_v6 = vand.u32 4294901760, %v3247_v41  ;;  %v3249_v42 = vsel %vm684_vm2, %v7743_v60, 0  ;;  %v7758_v3 = vadd.f32 %v1849_v32, %v1314_v57 }
 0x356   :  { %v7760_v8 = vand.u32 4294901760, %v3249_v42  ;;  %v3251_v2 = vsel %vm684_vm2, %v7748_v59, 0  ;;  %v1957_v62 = vrot.slane %v7748_v59, 7  ;;  %v1917_v47 = vrot.slane %v7743_v60, 6 }
 0x357   :  { %6469 = vmatprep.mubr.f32.mxu1 %v7754_v6  ;;  %v1956_v48 = vsel %vm1953_vm15, %v1954_v28, %v1955_v39  ;;  %v7768_v44 = vand.u32 4294901760, %v3251_v2  ;;  %v3253_v1 = vsel %vm684_vm2, %v7758_v3, 0  ;;  %v1951_v11 = vrot.slane %v7758_v3, 7 }
 0x358   :  { %6470 = vmatmul.mubr.f32.vlgmr.msra.gmra.mrb[2].mxu1 %v7760_v8  ;;  %v1994_v50 = vsel %vm684_vm2, %v1956_v48, 0  ;;  %v1958_v55 = vsel %vm1953_vm15, %v1955_v39, %v1957_v62  ;;  %v7780_v49 = vand.u32 4294901760, %v3253_v1  ;;  %v7787_v20 = vsub.f32 %v3247_v41, %v7754_v6 }
 0x359   :  { %6838 = vmatpush3.bf16.msra.mxu1 %v7631_v24  ;;  %6472 = vmatprep.mubr.f32.mxu1 %v7768_v44  ;;  %v1964_v5 = vsel %vm1953_vm15, %v1951_v11, %v1954_v28  ;;  %v7784_v13 = vand.u32 4294901760, %v1994_v50  ;;  %v1983_v14 = vsel %vm1971_vm4, %v1958_v55, 0.0  ;;  %v1959_v54 = vsel %vm1953_vm15, %v1957_v62, %v1951_v11  ;;  %v7843_v55 = vld [vmem:[#allocation2 + $0x60] sm:$0xff] }
 0x35a   :  { %6840 = vmatprep.subr.bf16.mxu1 %v7634_v25  ;;  %v1981_v24 = vsel %vm1969_vm0, %v1964_v5, 0.0  ;;  %v1997_v21 = vsel %vm684_vm2, %v1983_v14, 0  ;;  %v7808_v32 = vsub.f32 %v3249_v42, %v7760_v8  ;;  %v7817_v38 = vsub.f32 %v3251_v2, %v7768_v44  ;;  %v7845_v5 = vld [vmem:[#allocation2 + $0x68] sm:$0xff] }
 0x35b   :  { %v1991_v9 = vsel %vm684_vm2, %v1981_v24, 0  ;;  %v7794_v29 = vsub.f32 %v1994_v50, %v7784_v13  ;;  %v7796_v30 = vand.u32 4294901760, %v1997_v21  ;;  %v3888_v39 = vadd.s32 1, %v8651_v18 }
 0x35c   :  { %6473 = vmatmul.mubr.f32.gmra.mrb[4].mxu1 %v7780_v49  ;;  %v7801_v51 = vand.u32 4294901760, %v1991_v9  ;;  %v3877_v42 = vrot.slane %v7748_v59, 1  ;;  %v8660_v62 = vand.u32 15, %v7805_v31  ;;  %v7837_v11 = vsub.f32 %v3253_v1, %v7780_v49 }
 0x35d   :  { %6842 = vmatpush3.bf16.msra.mxu1 %v7634_v25  ;;  %6483 = vmatprep.mubr.f32.mxu1 %v7787_v20  ;;  %v8652_v36 = vand.u32 4294901760, %v7794_v29  ;;  %v7813_v37 = vsub.f32 %v1997_v21, %v7796_v30  ;;  %v2000_v25 = vsel %vm684_vm2, %v1959_v54, 0  ;;  %v3874_v14 = vrot.slane %v7739_v35, 1 }
 0x35e   :  { %6844 = vmatprep.subr.bf16.mxu1 %v7627_v43  ;;  %v7820_v57 = vsub.f32 %v1991_v9, %v7801_v51  ;;  %v7822_v41 = vand.u32 4294901760, %v2000_v25  ;;  %v3875_v24 = vrot.slane %v7743_v60, 1  ;;  %v8656_v1 = vand.u32 4294901760, %v7787_v20 }
 0x35f   :  { %v8654_v28 = vand.u32 4294901760, %v7813_v37  ;;  %v2084_v50 = vsub.f32 %v7794_v29, %v8652_v36  ;;  %vm3896_vm7 = vcmp.lt.s32.totalorder %v3888_v39, 16  ;;  %v3879_v18 = vrot.slane %v7758_v3, 1 }
 0x360   :  { %6484 = vmatmul.mubr.f32.vlgmr.msra.gmra.mrb[2].mxu1 %v7808_v32  ;;  %v8653_v2 = vand.u32 4294901760, %v7820_v57  ;;  %v7833_v48 = vsub.f32 %v2000_v25, %v7822_v41  ;;  %v3876_v10 = vsel %vm3873_vm6, %v3874_v14, %v3875_v24  ;;  %v3878_v34 = vsel %vm3873_vm6, %v3875_v24, %v3877_v42 }
 0x361   :  { %6486 = vmatprep.mubr.f32.mxu1 %v7817_v38  ;;  %6846 = vmatpush3.bf16.msra.mxu1 %v7627_v43  ;;  %v2094_v9 = vsub.f32 %v7813_v37, %v8654_v28  ;;  %v2085_v36 = vand.u32 4294901760, %v2084_v50  ;;  %v3890_v50 = vadd.s32 1, %v8660_v62  ;;  %v8663_v45 = vand.u32 4294901760, %v7817_v38 }
 0x362   :  { %6848 = vmatprep.subr.bf16.mxu1 %v7629_v23  ;;  %v2074_v21 = vsub.f32 %v7820_v57, %v8653_v2  ;;  %v8658_v54 = vand.u32 4294901760, %v7833_v48  ;;  %v8661_v2 = vand.u32 4294901760, %v7808_v32  ;;  %v3913_v24 = vsel %vm684_vm2, %v3876_v10, 0 }
 0x363   :  { %v8662_v62 = vand.u32 4294901760, %v7837_v11  ;;  %vm3898_vm8 = vcmp.lt.s32.totalorder %v3890_v50, 16  ;;  %v8692_v53 = vand.u32 4294901760, %v7845_v5  ;;  %vm1915_vm15 = vcmask 1041408  }
 0x364   :  { %6487 = vmatmul.mubr.f32.gmra.mrb[4].mxu1 %v7837_v11  ;;  %v2075_v25 = vand.u32 4294901760, %v2074_v21  ;;  %v2104_v28 = vsub.f32 %v7833_v48, %v8658_v54  ;;  %v7868_v21 = vld [vmem:[#allocation2 + $0x70] sm:$0xff]  ;;  %v7878_v54 = vld [vmem:[#allocation2 + $0x78] sm:$0xff] }
 0x365   :  { %6850 = vmatpush3.bf16.msra.mxu1 %v7629_v23  ;;  %6497 = vmatprep.mubr.f32.mxu1 %v8656_v1  ;;  %v2095_v1 = vand.u32 4294901760, %v2094_v9  ;;  %v8664_v9 = vand.u32 4294901760, %v7868_v21  ;;  %v3934_v10 = vand.u32 4294901760, %v7878_v54 }
 0x366   :  { %6852 = vmatprep.subr.bf16.mxu1 %v7647_v7  ;;  %6287 = vmatprep.mubr.f32.mxu0 %v2075_v25  ;;  %v8689_v25 = vand.u32 4294901760, %v7843_v55 }
 0x367   :  { %6288 = vmatmul.mubr.f32.vlgmr.msra.gmra.mrb[4].mxu0 %v2085_v36  ;;  %v2105_v36 = vand.u32 4294901760, %v2104_v28  ;;  %v4546_v28 = vrot.slane %v7748_v59, 2  ;;  %v7924_v50 = vsub.f32 %v7878_v54, %v3934_v10 }
 0x368   :  { %6498 = vmatmul.mubr.f32.vlgmr.msra.gmra.mrb[2].mxu1 %v8661_v2  ;;  %6290 = vmatprep.mubr.f32.mxu0 %v2095_v1  ;;  %v7886_v4 = vsub.f32 %v7843_v55, %v8689_v25  ;;  %v3904_v1 = vsel %vm3896_vm7, %v3878_v34, 0.0  ;;  %v3880_v25 = vsel %vm3873_vm6, %v3877_v42, %v3879_v18  ;;  %v7905_v34 = vand.u32 4294901760, %v3913_v24 }
 0x369   :  { %6734 = vmatpush3.bf16.msra.mxu0 %v7644_v46  ;;  %6500 = vmatprep.mubr.f32.mxu1 %v8663_v45  ;;  %v8690_v46 = vand.u32 4294901760, %v7845_v5  ;;  %v3916_v39 = vsel %vm684_vm2, %v3904_v1, 0  ;;  %v3919_v42 = vsel %vm684_vm2, %v3880_v25, 0  ;;  %v4548_v1 = vrot.slane %v7758_v3, 2 }
 0x36a   :  { %6854 = vmatpush3.bf16.msra.mxu1 %v7647_v7  ;;  %6736 = vmatprep.subr.bf16.mxu0 %v7649_v15  ;;  %v3886_v7 = vsel %vm3873_vm6, %v3879_v18, %v3874_v14  ;;  %v7931_v25 = vsub.f32 %v3913_v24, %v7905_v34 }
 0x36b   :  { %v7896_v2 = vsub.f32 %v7845_v5, %v8690_v46  ;;  %6856 = vmatprep.subr.bf16.mxu1 %v7651_v16  ;;  %6291 = vmatmul.mubr.f32.gmra.mrb[6].mxu0 %v2105_v36  ;;  %v8666_v46 = vand.u32 4294901760, %v7886_v4  ;;  %v3906_v14 = vsel %vm3898_vm8, %v3886_v7, 0.0  ;;  %v4544_v36 = vrot.slane %v7743_v60, 2 }
 0x36c   :  { %6501 = vmatmul.mubr.f32.gmra.mrb[4].mxu1 %v8662_v62  ;;  %6301 = vmatprep.mubr.f32.mxu0 %v7801_v51  ;;  %v7933_v7 = vand.u32 4294901760, %v3916_v39  ;;  %v7937_v62 = vand.u32 4294901760, %v3919_v42  ;;  %v3922_v54 = vsel %vm684_vm2, %v3906_v14, 0  ;;  %v7959_v0 = vsel %vm4542_vm5, %v4546_v28, %v4548_v1 }
 0x36d   :  { %6738 = vmatpush3.bf16.msra.mxu0 %v7649_v15  ;;  %6511 = vmatprep.mubr.f32.mxu1 %v7754_v6  ;;  %v8671_v18 = vand.u32 4294901760, %v7896_v2  ;;  %v7919_v15 = vsub.f32 %v7868_v21, %v8664_v9  ;;  %v7944_v9 = vsel %vm4542_vm5, %v4544_v36, %v4546_v28  ;;  %v4037_v24 = vsub.f32 %v7886_v4, %v8666_v46 }
 0x36e   :  { %6858 = vmatpush3.bf16.msra.mxu1 %v7651_v16  ;;  %6740 = vmatprep.subr.bf16.mxu0 %v7653_v63  ;;  %v4543_v16 = vrot.slane %v7739_v35, 2  ;;  %v8691_v46 = vand.u32 4294901760, %v7843_v55  ;;  %v7970_v56 = vsub.f32 %v3916_v39, %v7933_v7  ;;  %v8693_v55 = vand.u32 15, %v7396_v52 }
 0x36f   :  { %6860 = vmatprep.subr.bf16.mxu1 %v7627_v43  ;;  %v8694_v5 = vand.u32 4294901760, %v7868_v21  ;;  %v4038_v39 = vand.u32 4294901760, %v4037_v24  ;;  %v8697_v21 = vand.u32 4294901760, %v7924_v50  ;;  %v1916_v24 = vrot.slane %v7739_v35, 6 }
 0x370   :  { %6302 = vmatmul.mubr.f32.vlgmr.msra.gmra.mrb[4].mxu0 %v7784_v13  ;;  %v7941_v45 = vsel %vm4542_vm5, %v4543_v16, %v4544_v36  ;;  %v7967_v58 = vpack.c.bf16 %v8692_v53, %v8691_v46  ;;  %v7978_v36 = vsub.f32 %v3919_v42, %v7937_v62  ;;  %v1927_v14 = vadd.s32 4294967294, %v8693_v55 }
 0x371   :  { %6304 = vmatprep.mubr.f32.mxu0 %v7796_v30  ;;  %6742 = vmatpush3.bf16.msra.mxu0 %v7653_v63  ;;  %v4044_v63 = vsub.f32 %v7896_v2, %v8671_v18  ;;  %v7972_v18 = vand.u32 4294901760, %v3922_v54  ;;  %v7983_v53 = vsel %vm4542_vm5, %v4548_v1, %v4543_v16  ;;  %v8676_v46 = vrot.slane %v7758_v3, 6 }
 0x372   :  { %6512 = vmatmul.mubr.f32.vlgmr.msra.gmra.mrb[2].mxu1 %v7760_v8  ;;  %6744 = vmatprep.subr.bf16.mxu0 %v7655_v17  ;;  %v8695_v42 = vand.u32 4294901760, %v7787_v20  ;;  %v8696_v1 = vand.u32 4294901760, %v7919_v15  ;;  %v8700_v35 = vand.u32 4294901760, %v7931_v25  ;;  %vm1931_vm0 = vcmp.ge.s32.totalorder %v1927_v14, 0 }
 0x373   :  { %6514 = vmatprep.mubr.f32.mxu1 %v7768_v44  ;;  %6862 = vmatpush3.bf16.msra.mxu1 %v7627_v43  ;;  %v4045_v16 = vand.u32 4294901760, %v4044_v63  ;;  %v8705_v60 = vand.u32 4294901760, %v7978_v36  ;;  %v1918_v27 = vsel %vm1915_vm15, %v1916_v24, %v1917_v47 }
 0x374   :  { %6305 = vmatmul.mubr.f32.gmra.mrb[6].mxu0 %v7822_v41  ;;  %6864 = vmatprep.subr.bf16.mxu1 %v7629_v23  ;;  %v7995_v28 = vsub.f32 %v7787_v20, %v8695_v42  ;;  %v4051_v55 = vsub.f32 %v7919_v15, %v8696_v1  ;;  %v8699_v42 = vand.u32 4294901760, %v7817_v38  ;;  %v8028_v20 = vld [vmem:[#allocation2] sm:$0xff] }
 0x375   :  { %6746 = vmatpush3.bf16.msra.mxu0 %v7655_v17  ;;  %6315 = vmatprep.mubr.f32.mxu0 %v7820_v57  ;;  %v7989_v17 = vpack.c.bf16 %v3934_v10, %v8694_v5  ;;  %v4058_v10 = vsub.f32 %v7924_v50, %v8697_v21  ;;  %v8010_v5 = vsub.f32 %v3922_v54, %v7972_v18  ;;  %v8702_v54 = vand.u32 15, %v7728_v19 }
 0x376   :  { %6515 = vmatmul.mubr.f32.gmra.mrb[4].mxu1 %v7780_v49  ;;  %6748 = vmatprep.subr.bf16.mxu0 %v7636_v33  ;;  %v8020_v1 = vsub.f32 %v7817_v38, %v8699_v42  ;;  %v3996_v21 = vsub.f32 %v7931_v25, %v8700_v35  ;;  %v8037_v38 = vld [vmem:[#allocation2 + $0x8] sm:$0xff]  ;;  %v1926_v42 = vsel %vm1915_vm15, %v8676_v46, %v1916_v24  ;;  %v1919_v35 = vrot.slane %v7748_v59, 6 }
 0x377   :  { %6866 = vmatpush3.bf16.msra.mxu1 %v7629_v23  ;;  %6525 = vmatprep.mubr.f32.mxu1 %v7754_v6  ;;  %v8698_v6 = vand.u32 4294901760, %v7808_v32  ;;  %v1929_v26 = vadd.s32 4294967294, %v8702_v54  ;;  %v8703_v46 = vand.u32 4294901760, %v7970_v56  ;;  %v4025_v19 = vand.u32 4294901760, %v8010_v5 }
 0x378   :  { %6316 = vmatmul.mubr.f32.vlgmr.msra.gmra.mrb[4].mxu0 %v7794_v29  ;;  %6868 = vmatprep.subr.bf16.mxu1 %v7967_v58  ;;  %v2629_v54 = vand.u32 4294901760, %v8028_v20  ;;  %v8708_v24 = vand.u32 4294901760, %v7833_v48 }
 0x379   :  { %v8015_v63 = vsub.f32 %v7808_v32, %v8698_v6  ;;  %6318 = vmatprep.mubr.f32.mxu0 %v7813_v37  ;;  %6750 = vmatpush3.bf16.msra.mxu0 %v7636_v33  ;;  %v8701_v32 = vand.u32 4294901760, %v7837_v11  ;;  %v4006_v59 = vsub.f32 %v7970_v56, %v8703_v46  ;;  %v1920_v46 = vsel %vm1915_vm15, %v1917_v47, %v1919_v35 }
 0x37a   :  { %6526 = vmatmul.mubr.f32.vlgmr.msra.gmra.mrb[2].mxu1 %v7760_v8  ;;  %6752 = vmatprep.subr.bf16.mxu0 %v7640_v40  ;;  %v4052_v8 = vand.u32 4294901760, %v4051_v55  ;;  %v2632_v55 = vand.u32 4294901760, %v8037_v38  ;;  %vm1933_vm4 = vcmp.ge.s32.totalorder %v1929_v26, 0  ;;  %v6883_v26 = vpack.c.bf16 %v7896_v2, %v7886_v4 }
 0x37b   :  { %v8033_v6 = vsub.f32 %v7837_v11, %v8701_v32  ;;  %6528 = vmatprep.mubr.f32.mxu1 %v7768_v44  ;;  %6870 = vmatpush3.bf16.msra.mxu1 %v7967_v58  ;;  %v6875_v11 = vpack.c.bf16 %v4045_v16, %v4038_v39  ;;  %v4059_v32 = vand.u32 4294901760, %v4058_v10  ;;  %v8704_v44 = vand.u32 4294901760, %v7820_v57 }
 0x37c   :  { %6319 = vmatmul.mubr.f32.gmra.mrb[6].mxu0 %v7833_v48  ;;  %6872 = vmatprep.subr.bf16.mxu1 %v7989_v17  ;;  %v3997_v39 = vand.u32 4294901760, %v3996_v21  ;;  %v4016_v16 = vsub.f32 %v7978_v36, %v8705_v60  ;;  %v1943_v10 = vsel %vm1931_vm0, %v1926_v42, 0.0  ;;  %v8067_v21 = vld [vmem:[#allocation2 + $0x10] sm:$0xff]  ;;  %v8706_v60 = vand.u32 4294901760, %v7794_v29 }
 0x37d   :  { %6754 = vmatpush3.bf16.msra.mxu0 %v7640_v40  ;;  %6329 = vmatprep.mubr.f32.mxu0 %v8704_v44  ;;  %v6879_v57 = vpack.c.bf16 %v4059_v32, %v4052_v8  ;;  %v8069_v44 = vld [vmem:[#allocation2 + $0x18] sm:$0xff]  ;;  %v4007_v14 = vand.u32 4294901760, %v4006_v59  ;;  %v2617_v42 = vsel %vm684_vm2, %v1943_v10, 0  ;;  %v8082_v32 = vsub.f32 %v8028_v20, %v2629_v54 }
 0x37e   :  { %6529 = vmatmul.mubr.f32.gmra.mrb[4].mxu1 %v7780_v49  ;;  %6756 = vmatprep.subr.bf16.mxu0 %v7657_v61  ;;  %v4026_v49 = vsub.f32 %v8010_v5, %v4025_v19  ;;  %v4017_v8 = vand.u32 4294901760, %v4016_v16  ;;  %v8085_v29 = vsub.f32 %v8037_v38, %v2632_v55  ;;  %v1945_v59 = vsel %vm1933_vm4, %v1920_v46, 0.0 }
 0x37f   :  { %6874 = vmatpush3.bf16.msra.mxu1 %v7989_v17  ;;  %6539 = vmatprep.mubr.f32.mxu1 %v3997_v39  ;;  %v8707_v39 = vand.u32 4294901760, %v7813_v37  ;;  %v2635_v10 = vand.u32 4294901760, %v8067_v21  ;;  %v2638_v47 = vand.u32 4294901760, %v8069_v44  ;;  %v8091_v37 = vand.u32 4294901760, %v2617_v42 }
 0x380   :  { %6330 = vmatmul.mubr.f32.vlgmr.msra.gmra.mrb[4].mxu0 %v8706_v60  ;;  %6876 = vmatprep.subr.bf16.mxu1 %v6875_v11  ;;  %v4027_v20 = vand.u32 4294901760, %v4026_v49  ;;  %v2623_v38 = vsel %vm684_vm2, %v1945_v59, 0  ;;  %v8709_v16 = vrot.slane %v7758_v3, 6  ;;  %v2747_v48 = vand.u32 4294901760, %v8085_v29 }
 0x381   :  { %6332 = vmatprep.mubr.f32.mxu0 %v8707_v39  ;;  %6758 = vmatpush3.bf16.msra.mxu0 %v7657_v61  ;;  %v2620_v61 = vsel %vm684_vm2, %v1918_v27, 0  ;;  %v2740_v27 = vand.u32 4294901760, %v8082_v32  ;;  %v8110_v60 = vsub.f32 %v8067_v21, %v2635_v10  ;;  %v8113_v3 = vsub.f32 %v8069_v44, %v2638_v47 }
 0x382   :  { %6540 = vmatmul.mubr.f32.vlgmr.msra.gmra.mrb[2].mxu1 %v4007_v14  ;;  %6760 = vmatprep.subr.bf16.mxu0 %v7659_v22  ;;  %v1921_v46 = vsel %vm1915_vm15, %v1919_v35, %v8709_v16  ;;  %v8119_v35 = vand.u32 4294901760, %v2623_v38  ;;  %v6887_v21 = vpack.c.bf16 %v7924_v50, %v7919_v15  ;;  %v2748_v49 = vsub.f32 %v8085_v29, %v2747_v48 }
 0x383   :  { %6542 = vmatprep.mubr.f32.mxu1 %v4017_v8  ;;  %6878 = vmatpush3.bf16.msra.mxu1 %v6875_v11  ;;  %v8107_v11 = vand.u32 4294901760, %v2620_v61  ;;  %v2626_v14 = vsel %vm684_vm2, %v1921_v46, 0  ;;  %v2741_v44 = vsub.f32 %v8082_v32, %v2740_v27  ;;  %v8152_v59 = vpack.c.bf16 %v2638_v47, %v2635_v10 }
 0x384   :  { %6333 = vmatmul.mubr.f32.gmra.mrb[6].mxu0 %v8708_v24  ;;  %6880 = vmatprep.subr.bf16.mxu1 %v6879_v57  ;;  %v8140_v39 = vand.u32 4294901760, %v2626_v14  ;;  %v8147_v8 = vsub.f32 %v2623_v38, %v8119_v35  ;;  %v2749_v24 = vand.u32 4294901760, %v2748_v49  ;;  %v8710_v16 = vand.u32 15, %v7774_v12 }
 0x385   :  { %6762 = vmatpush3.bf16.msra.mxu0 %v7659_v22  ;;  %6343 = vmatprep.mubr.f32.mxu0 %v7801_v51  ;;  %v8117_v22 = vsub.f32 %v2617_v42, %v8091_v37  ;;  %v8138_v42 = vsub.f32 %v2620_v61, %v8107_v11  ;;  %v2742_v61 = vand.u32 4294901760, %v2741_v44  ;;  %v8711_v49 = vand.u32 4294901760, %v7886_v4 }
 0x386   :  { %6543 = vmatmul.mubr.f32.gmra.mrb[4].mxu1 %v4027_v20  ;;  %6764 = vmatprep.subr.bf16.mxu0 %v7636_v33  ;;  %v8679_v10 = vand.u32 4294901760, %v8147_v8  ;;  %v4557_v46 = vadd.s32 2, %v8710_v16  ;;  %v8713_v4 = vand.u32 4294901760, %v7931_v25 }
 0x387   :  { %6882 = vmatpush3.bf16.msra.mxu1 %v6879_v57  ;;  %6553 = vmatprep.mubr.f32.mxu1 %v7905_v34  ;;  %v8127_v57 = vpack.c.bf16 %v2632_v55, %v2629_v54  ;;  %v2761_v54 = vand.u32 4294901760, %v8113_v3  ;;  %v2699_v55 = vand.u32 4294901760, %v8117_v22  ;;  %v2709_v20 = vand.u32 4294901760, %v8138_v42 }
 0x388   :  { %6344 = vmatmul.mubr.f32.vlgmr.msra.gmra.mrb[4].mxu0 %v7784_v13  ;;  %6884 = vmatprep.subr.bf16.mxu1 %v6883_v26  ;;  %v6779_v47 = vpack.c.bf16 %v2749_v24, %v2742_v61  ;;  %v2720_v12 = vsub.f32 %v8147_v8, %v8679_v10  ;;  %v8712_v61 = vand.u32 4294901760, %v7896_v2  ;;  %vm4565_vm6 = vcmp.lt.s32.totalorder %v4557_v46, 16 }
 0x389   :  { %6346 = vmatprep.mubr.f32.mxu0 %v7796_v30  ;;  %6766 = vmatpush3.bf16.msra.mxu0 %v7636_v33  ;;  %v2754_v33 = vand.u32 4294901760, %v8110_v60  ;;  %v8715_v10 = vand.u32 4294901760, %v7919_v15  ;;  %v4573_v15 = vsel %vm4565_vm6, %v7944_v9, 0.0  ;;  %v4588_v46 = vsel %vm684_vm2, %v7959_v0, 0 }
 0x38a   :  { %6554 = vmatmul.mubr.f32.vlgmr.msra.gmra.mrb[2].mxu1 %v7933_v7  ;;  %6768 = vmatprep.subr.bf16.mxu0 %v7640_v40  ;;  %v6899_v24 = vpack.c.bf16 %v8712_v61, %v8711_v49  ;;  %v2721_v2 = vand.u32 4294901760, %v2720_v12  ;;  %v8714_v61 = vand.u32 15, %v7805_v31  ;;  %v8717_v12 = vand.u32 4294901760, %v7970_v56 }
 0x38b   :  { %6556 = vmatprep.mubr.f32.mxu1 %v7937_v62  ;;  %6886 = vmatpush3.bf16.msra.mxu1 %v6883_v26  ;;  %v8158_v26 = vsub.f32 %v2626_v14, %v8140_v39  ;;  %v2755_v38 = vsub.f32 %v8110_v60, %v2754_v33  ;;  %v2710_v14 = vsub.f32 %v8138_v42, %v2709_v20  ;;  %v4585_v9 = vsel %vm684_vm2, %v4573_v15, 0 }
 0x38c   :  { %6347 = vmatmul.mubr.f32.gmra.mrb[6].mxu0 %v7822_v41  ;;  %6888 = vmatprep.subr.bf16.mxu1 %v6887_v21  ;;  %v6787_v31 = vpack.c.bf16 %v8085_v29, %v8082_v32 }
 0x38d   :  { %6770 = vmatpush3.bf16.msra.mxu0 %v7640_v40  ;;  %6357 = vmatprep.mubr.f32.mxu0 %v7801_v51  ;;  %v2762_v40 = vsub.f32 %v8113_v3, %v2761_v54  ;;  %v2700_v51 = vsub.f32 %v8117_v22, %v2699_v55 }
 0x38e   :  { %6557 = vmatmul.mubr.f32.gmra.mrb[4].mxu1 %v7972_v18  ;;  %6772 = vmatprep.subr.bf16.mxu0 %v8127_v57 }
 0x38f   :  { %6890 = vmatpush3.bf16.msra.mxu1 %v6887_v21  ;;  %6567 = vmatprep.mubr.f32.mxu1 %v7931_v25  ;;  %v2756_v21 = vand.u32 4294901760, %v2755_v38  ;;  %v2763_v44 = vand.u32 4294901760, %v2762_v40  ;;  %v8194_v38 = vld [vmem:[#allocation2 + $0x80] sm:$0xff]  ;;  %v8196_v40 = vld [vmem:[#allocation2 + $0x88] sm:$0xff]  ;;  %v4580_v25 = vld [vmem:[#allocation2 + $0x98] sm:$0xff] }
 0x390   :  { %6358 = vmatmul.mubr.f32.vlgmr.msra.gmra.mrb[4].mxu0 %v7784_v13  ;;  %6892 = vmatprep.subr.bf16.mxu1 %v7967_v58  ;;  %v8680_v13 = vand.u32 4294901760, %v8158_v26  ;;  %v4594_v49 = vand.u32 4294901760, %v8194_v38 }
 0x391   :  { %6360 = vmatprep.mubr.f32.mxu0 %v7796_v30  ;;  %6774 = vmatpush3.bf16.msra.mxu0 %v8127_v57  ;;  %v2701_v30 = vand.u32 4294901760, %v2700_v51  ;;  %v2711_v51 = vand.u32 4294901760, %v2710_v14  ;;  %v6783_v16 = vpack.c.bf16 %v2763_v44, %v2756_v21  ;;  %v4559_v14 = vadd.s32 2, %v8714_v61 }
 0x392   :  { %6568 = vmatmul.mubr.f32.vlgmr.msra.gmra.mrb[2].mxu1 %v7970_v56  ;;  %6776 = vmatprep.subr.bf16.mxu0 %v8152_v59  ;;  %v8716_v21 = vand.u32 4294901760, %v7924_v50  ;;  %v8718_v50 = vand.u32 4294901760, %v7978_v36 }
 0x393   :  { %6570 = vmatprep.mubr.f32.mxu1 %v7978_v36  ;;  %6894 = vmatpush3.bf16.msra.mxu1 %v7967_v58  ;;  %vm4567_vm7 = vcmp.lt.s32.totalorder %v4559_v14, 16  ;;  %v6791_v36 = vpack.c.bf16 %v8113_v3, %v8110_v60  ;;  %v8720_v3 = vand.u32 4294901760, %v8158_v26 }
 0x394   :  { %6361 = vmatmul.mubr.f32.gmra.mrb[6].mxu0 %v7822_v41  ;;  %6896 = vmatprep.subr.bf16.mxu1 %v7989_v17  ;;  %v2730_v41 = vsub.f32 %v8158_v26, %v8680_v13  ;;  %v6903_v44 = vpack.c.bf16 %v8716_v21, %v8715_v10  ;;  %v4579_v13 = vld [vmem:[#allocation2 + $0x90] sm:$0xff]  ;;  %v8225_v10 = vsub.f32 %v8194_v38, %v4594_v49 }
 0x395   :  { %6778 = vmatpush3.bf16.msra.mxu0 %v8152_v59  ;;  %6371 = vmatprep.mubr.f32.mxu0 %v2701_v30  ;;  %v4597_v30 = vand.u32 4294901760, %v8196_v40 }
 0x396   :  { %6571 = vmatmul.mubr.f32.gmra.mrb[4].mxu1 %v8010_v5  ;;  %6780 = vmatprep.subr.bf16.mxu0 %v6779_v47  ;;  %v4705_v38 = vand.u32 4294901760, %v8225_v10  ;;  %v8246_v5 = vand.u32 4294901760, %v4585_v9 }
 0x397   :  { %6898 = vmatpush3.bf16.msra.mxu1 %v7989_v17  ;;  %6581 = vmatprep.mubr.f32.mxu1 %v8713_v4  ;;  %v2731_v4 = vand.u32 4294901760, %v2730_v41  ;;  %v8228_v56 = vsub.f32 %v8196_v40, %v4597_v30  ;;  %v4603_v41 = vand.u32 4294901760, %v4580_v25 }
 0x398   :  { %6372 = vmatmul.mubr.f32.vlgmr.msra.gmra.mrb[4].mxu0 %v2711_v51  ;;  %6900 = vmatprep.subr.bf16.mxu1 %v6899_v24  ;;  %v4582_v51 = vsel %vm684_vm2, %v7941_v45, 0  ;;  %v4706_v61 = vsub.f32 %v8225_v10, %v4705_v38  ;;  %v8273_v21 = vsub.f32 %v4585_v9, %v8246_v5 }
 0x399   :  { %6374 = vmatprep.mubr.f32.mxu0 %v2721_v2  ;;  %6782 = vmatpush3.bf16.msra.mxu0 %v6779_v47  ;;  %v4600_v47 = vand.u32 4294901760, %v4579_v13  ;;  %v8231_v45 = vand.u32 4294901760, %v4582_v51  ;;  %v4712_v40 = vand.u32 4294901760, %v8228_v56 }
 0x39a   :  { %6582 = vmatmul.mubr.f32.vlgmr.msra.gmra.mrb[2].mxu1 %v8717_v12  ;;  %6784 = vmatprep.subr.bf16.mxu0 %v6783_v16 }
 0x39b   :  { %6584 = vmatprep.mubr.f32.mxu1 %v8718_v50  ;;  %6902 = vmatpush3.bf16.msra.mxu1 %v6899_v24  ;;  %v4575_v24 = vsel %vm4567_vm7, %v7983_v53, 0.0  ;;  %v8254_v0 = vsub.f32 %v4582_v51, %v8231_v45  ;;  %v8256_v53 = vand.u32 4294901760, %v4588_v46  ;;  %v4713_v14 = vsub.f32 %v8228_v56, %v4712_v40 }
 0x39c   :  { %6375 = vmatmul.mubr.f32.gmra.mrb[6].mxu0 %v2731_v4  ;;  %6904 = vmatprep.subr.bf16.mxu1 %v6903_v44  ;;  %v4591_v2 = vsel %vm684_vm2, %v4575_v24, 0  ;;  %v8288_v12 = vpack.c.bf16 %v4603_v41, %v4600_v47  ;;  %v4707_v4 = vand.u32 4294901760, %v4706_v61  ;;  %v4674_v51 = vand.u32 4294901760, %v8273_v21 }
 0x39d   :  { %6786 = vmatpush3.bf16.msra.mxu0 %v6783_v16  ;;  %6385 = vmatprep.mubr.f32.mxu0 %v8091_v37  ;;  %v8250_v16 = vsub.f32 %v4580_v25, %v4603_v41  ;;  %v8282_v25 = vsub.f32 %v4588_v46, %v8256_v53  ;;  %v6803_v41 = vpack.c.bf16 %v2747_v48, %v2740_v27 }
 0x39e   :  { %6585 = vmatmul.mubr.f32.gmra.mrb[4].mxu1 %v4025_v19  ;;  %6788 = vmatprep.subr.bf16.mxu0 %v6787_v31  ;;  %v8248_v19 = vsub.f32 %v4579_v13, %v4600_v47  ;;  %v8262_v13 = vpack.c.bf16 %v4597_v30, %v4594_v49  ;;  %v4664_v30 = vand.u32 4294901760, %v8254_v0  ;;  %v6807_v27 = vpack.c.bf16 %v2761_v54, %v2754_v33 }
 0x39f   :  { %6906 = vmatpush3.bf16.msra.mxu1 %v6903_v44  ;;  %6595 = vmatprep.mubr.f32.mxu1 %v7905_v34  ;;  %v8275_v44 = vand.u32 4294901760, %v4591_v2  ;;  %v4726_v49 = vand.u32 4294901760, %v8250_v16  ;;  %v4684_v47 = vand.u32 4294901760, %v8282_v25  ;;  %v6931_v33 = vpack.c.bf16 %v8228_v56, %v8225_v10  ;;  %v8415_v10 = vld [vmem:[%s8647_s5] sm:$0xff]  ;;  %s7277_s5 = smov 32  }
 0x3a0   :  { %6386 = vmatmul.mubr.f32.vlgmr.msra.gmra.mrb[4].mxu0 %v8107_v11  ;;  %6908 = vmatprep.subr.bf16.mxu1 %v7967_v58  ;;  %v6935_v54 = vpack.c.bf16 %v8250_v16, %v8248_v19 }
 0x3a1   :  { %6388 = vmatprep.mubr.f32.mxu0 %v8119_v35  ;;  %6790 = vmatpush3.bf16.msra.mxu0 %v6787_v31  ;;  %v4714_v31 = vand.u32 4294901760, %v4713_v14  ;;  %v8294_v15 = vsub.f32 %v4591_v2, %v8275_v44  ;;  %v4685_v29 = vsub.f32 %v8282_v25, %v4684_v47 }
 0x3a2   :  { %6596 = vmatmul.mubr.f32.vlgmr.msra.gmra.mrb[2].mxu1 %v7933_v7  ;;  %6792 = vmatprep.subr.bf16.mxu0 %v6791_v36 }
 0x3a3   :  { %6598 = vmatprep.mubr.f32.mxu1 %v7937_v62  ;;  %6910 = vmatpush3.bf16.msra.mxu1 %v7967_v58  ;;  %v4719_v58 = vand.u32 4294901760, %v8248_v19  ;;  %v6923_v9 = vpack.c.bf16 %v4714_v31, %v4707_v4  ;;  %v4686_v60 = vand.u32 4294901760, %v4685_v29 }
 0x3a4   :  { %6389 = vmatmul.mubr.f32.gmra.mrb[6].mxu0 %v8140_v39  ;;  %6912 = vmatprep.subr.bf16.mxu1 %v7989_v17 }
 0x3a5   :  { %6794 = vmatpush3.bf16.msra.mxu0 %v6791_v36  ;;  %6399 = vmatprep.mubr.f32.mxu0 %v8117_v22  ;;  %v4720_v50 = vsub.f32 %v8248_v19, %v4719_v58  ;;  %v4694_v36 = vand.u32 4294901760, %v8294_v15 }
 0x3a6   :  { %6599 = vmatmul.mubr.f32.gmra.mrb[4].mxu1 %v7972_v18  ;;  %6796 = vmatprep.subr.bf16.mxu0 %v8127_v57 }
 0x3a7   :  { %6914 = vmatpush3.bf16.msra.mxu1 %v7989_v17  ;;  %6609 = vmatprep.mubr.f32.mxu1 %v7905_v34  ;;  %v4727_v34 = vsub.f32 %v8250_v16, %v4726_v49  ;;  %v4665_v17 = vsub.f32 %v8254_v0, %v4664_v30  ;;  %v4721_v46 = vand.u32 4294901760, %v4720_v50  ;;  %v4695_v22 = vsub.f32 %v8294_v15, %v4694_v36 }
 0x3a8   :  { %6400 = vmatmul.mubr.f32.vlgmr.msra.gmra.mrb[4].mxu0 %v8138_v42  ;;  %6916 = vmatprep.subr.bf16.mxu1 %v8262_v13 }
 0x3a9   :  { %6402 = vmatprep.mubr.f32.mxu0 %v8147_v8  ;;  %6798 = vmatpush3.bf16.msra.mxu0 %v8127_v57  ;;  %v4728_v32 = vand.u32 4294901760, %v4727_v34  ;;  %v4696_v42 = vand.u32 4294901760, %v4695_v22 }
 0x3aa   :  { %6610 = vmatmul.mubr.f32.vlgmr.msra.gmra.mrb[2].mxu1 %v7933_v7  ;;  %6800 = vmatprep.subr.bf16.mxu0 %v8152_v59  ;;  %v4675_v7 = vsub.f32 %v8273_v21, %v4674_v51 }
 0x3ab   :  { %6612 = vmatprep.mubr.f32.mxu1 %v7937_v62  ;;  %6918 = vmatpush3.bf16.msra.mxu1 %v8262_v13  ;;  %v4666_v62 = vand.u32 4294901760, %v4665_v17 }
 0x3ac   :  { %6403 = vmatmul.mubr.f32.gmra.mrb[6].mxu0 %v8158_v26  ;;  %6920 = vmatprep.subr.bf16.mxu1 %v8288_v12  ;;  %v4676_v48 = vand.u32 4294901760, %v4675_v7 }
 0x3ad   :  { %6802 = vmatpush3.bf16.msra.mxu0 %v8152_v59  ;;  %6413 = vmatprep.mubr.f32.mxu0 %v2699_v55  ;;  %v6927_v55 = vpack.c.bf16 %v4728_v32, %v4721_v46 }
 0x3ae   :  { %6613 = vmatmul.mubr.f32.gmra.mrb[4].mxu1 %v7972_v18  ;;  %6804 = vmatprep.subr.bf16.mxu0 %v6803_v41  ;;  %v8719_v18 = vand.u32 4294901760, %v8147_v8 }
 0x3af   :  { %6922 = vmatpush3.bf16.msra.mxu1 %v8288_v12  ;;  %6623 = vmatprep.mubr.f32.mxu1 %v4666_v62 }
 0x3b0   :  { %6414 = vmatmul.mubr.f32.vlgmr.msra.gmra.mrb[4].mxu0 %v2709_v20  ;;  %6924 = vmatprep.subr.bf16.mxu1 %v6923_v9 }
 0x3b1   :  { %6416 = vmatprep.mubr.f32.mxu0 %v8719_v18  ;;  %6806 = vmatpush3.bf16.msra.mxu0 %v6803_v41 }
 0x3b2   :  { %6624 = vmatmul.mubr.f32.vlgmr.msra.gmra.mrb[2].mxu1 %v4676_v48  ;;  %6808 = vmatprep.subr.bf16.mxu0 %v6807_v27 }
 0x3b3   :  { %6626 = vmatprep.mubr.f32.mxu1 %v4686_v60  ;;  %6926 = vmatpush3.bf16.msra.mxu1 %v6923_v9 }
 0x3b4   :  { %6417 = vmatmul.mubr.f32.gmra.mrb[6].mxu0 %v8720_v3  ;;  %6928 = vmatprep.subr.bf16.mxu1 %v6927_v55 }
 0x3b5   :  { %6810 = vmatpush3.bf16.msra.mxu0 %v6807_v27  ;;  %6427 = vmatprep.mubr.f32.mxu0 %v8091_v37 }
 0x3b6   :  { %6627 = vmatmul.mubr.f32.gmra.mrb[4].mxu1 %v4696_v42  ;;  %6812 = vmatprep.subr.bf16.mxu0 %v8127_v57 }
 0x3b7   :  { %6930 = vmatpush3.bf16.msra.mxu1 %v6927_v55  ;;  %6637 = vmatprep.mubr.f32.mxu1 %v8231_v45 }
 0x3b8   :  { %6428 = vmatmul.mubr.f32.vlgmr.msra.gmra.mrb[4].mxu0 %v8107_v11  ;;  %6932 = vmatprep.subr.bf16.mxu1 %v6931_v33 }
 0x3b9   :  { %6430 = vmatprep.mubr.f32.mxu0 %v8119_v35  ;;  %6814 = vmatpush3.bf16.msra.mxu0 %v8127_v57 }
 0x3ba   :  { %6638 = vmatmul.mubr.f32.vlgmr.msra.gmra.mrb[2].mxu1 %v8246_v5  ;;  %6816 = vmatprep.subr.bf16.mxu0 %v8152_v59 }
 0x3bb   :  { %6640 = vmatprep.mubr.f32.mxu1 %v8256_v53  ;;  %6934 = vmatpush3.bf16.msra.mxu1 %v6931_v33 }
 0x3bc   :  { %6431 = vmatmul.mubr.f32.gmra.mrb[6].mxu0 %v8140_v39  ;;  %6936 = vmatprep.subr.bf16.mxu1 %v6935_v54 }
 0x3bd   :  { %6818 = vmatpush3.bf16.msra.mxu0 %v8152_v59  ;;  %6441 = vmatprep.mubr.f32.mxu0 %v8091_v37  ;;  %v3328_v37 = vand.u32 4294901760, %v7995_v28  ;;  %v3348_v28 = vand.u32 4294901760, %v8020_v1 }
 0x3be   :  { %6641 = vmatmul.mubr.f32.gmra.mrb[4].mxu1 %v8275_v44  ;;  %6820 = vmatprep.subr.bf16.mxu0 %v7627_v43 }
 0x3bf   :  { %6938 = vmatpush3.bf16.msra.mxu1 %v6935_v54  ;;  %6651 = vmatprep.mubr.f32.mxu1 %v8254_v0 }
 0x3c0   :  { %6442 = vmatmul.mubr.f32.vlgmr.msra.gmra.mrb[4].mxu0 %v8107_v11  ;;  %6940 = vmatprep.subr.bf16.mxu1 %v8262_v13  ;;  %v6947_v11 = vpack.c.bf16 %v4712_v40, %v4705_v38 }
 0x3c1   :  { %6444 = vmatprep.mubr.f32.mxu0 %v8119_v35  ;;  %6822 = vmatpush3.bf16.msra.mxu0 %v7627_v43  ;;  %v3338_v43 = vand.u32 4294901760, %v8015_v63  ;;  %v3358_v63 = vand.u32 4294901760, %v8033_v6 }
 0x3c2   :  { %6652 = vmatmul.mubr.f32.vlgmr.msra.gmra.mrb[2].mxu1 %v8273_v21  ;;  %6824 = vmatprep.subr.bf16.mxu0 %v7629_v23 }
 0x3c3   :  { %6654 = vmatprep.mubr.f32.mxu1 %v8282_v25  ;;  %6942 = vmatpush3.bf16.msra.mxu1 %v8262_v13 }
 0x3c4   :  { %6445 = vmatmul.mubr.f32.gmra.mrb[6].mxu0 %v8140_v39  ;;  %6944 = vmatprep.subr.bf16.mxu1 %v8288_v12  ;;  %v5213_v39 = vsub.s32 3, %v7396_v52 }
 0x3c5   :  { %6826 = vmatpush3.bf16.msra.mxu0 %v7629_v23  ;;  %6455 = vmatprep.mubr.f32.mxu0 %v3328_v37  ;;  %v6951_v23 = vpack.c.bf16 %v4726_v49, %v4719_v58 }
 0x3c6   :  { %6655 = vmatmul.mubr.f32.gmra.mrb[4].mxu1 %v8294_v15  ;;  %6956 = vmatprep.subr.bf16.mxu0 %v8262_v13  ;;  %v5214_v56 = vrot.slane %v8415_v10, %v5213_v39 }
 0x3c7   :  { %6946 = vmatpush3.bf16.msra.mxu1 %v8288_v12  ;;  %6665 = vmatprep.mubr.f32.mxu1 %v4664_v30 }
 0x3c8   :  { %6456 = vmatmul.mubr.f32.vlgmr.msra.gmra.mrb[4].mxu0 %v3338_v43  ;;  %6948 = vmatprep.subr.bf16.mxu1 %v6947_v11 }
 0x3c9   :  { %6458 = vmatprep.mubr.f32.mxu0 %v3348_v28  ;;  %6958 = vmatpush3.bf16.msra.mxu0 %v8262_v13 }
 0x3ca   :  { %6666 = vmatmul.mubr.f32.vlgmr.msra.gmra.mrb[2].mxu1 %v4674_v51  ;;  %6960 = vmatprep.subr.bf16.mxu0 %v8288_v12 }
 0x3cb   :  { %6668 = vmatprep.mubr.f32.mxu1 %v4684_v47  ;;  %6950 = vmatpush3.bf16.msra.mxu1 %v6947_v11 }
 0x3cc   :  { %6459 = vmatmul.mubr.f32.gmra.mrb[6].mxu0 %v3358_v63  ;;  %6952 = vmatprep.subr.bf16.mxu1 %v6951_v23 }
 0x3cd   :  { %6962 = vmatpush3.bf16.msra.mxu0 %v8288_v12  ;;  %6693 = vmatprep.mubr.f32.mxu0 %v8231_v45 }
 0x3ce   :  { %6669 = vmatmul.mubr.f32.gmra.mrb[4].mxu1 %v4694_v36 }
 0x3cf   :  { %6954 = vmatpush3.bf16.msra.mxu1 %v6951_v23  ;;  %6679 = vmatprep.mubr.f32.mxu1 %v8231_v45 }
 0x3d0   :  { %6694 = vmatmul.mubr.f32.vlgmr.msra.gmra.mrb[8].mxu0 %v8246_v5  ;;  %6963 = vmatprep.subr.bf16.mxu1 %v8262_v13 }
 0x3d2   :  { %6680 = vmatmul.mubr.f32.vlgmr.msra.gmra.mrb[2].mxu1 %v8246_v5 }
 0x3d3   :  { %6682 = vmatprep.mubr.f32.mxu1 %v8256_v53  ;;  %6965 = vmatpush3.bf16.msra.mxu1 %v8262_v13 }
 0x3d4   :  { %6964 = vmatprep.subr.bf16.mxu1 %v8288_v12 }
 0x3d6   :  { %6683 = vmatmul.mubr.f32.gmra.mrb[4].mxu1 %v8275_v44 }
 0x3d7   :  { %6696 = vmatprep.mubr.f32.mxu1 %v8256_v53  ;;  %6966 = vmatpush3.bf16.msra.mxu1 %v8288_v12 }
 0x3de   :  { %6697 = vmatmul.mubr.f32.vlgmr.msra.gmra.mrb[4].mxu1 %v8275_v44 }
 0x49b   :  { %v6457_v1 = vpop.f32.mrb[4].mxu0 }
 0x49c   :  { %v3330_v6 = vpop.f32.mrb[5].mxu0 }
 0x49f   :  { %v6460_v35 = vpop.f32.mrb[6].mxu0 }
 0x4a0   :  { %v3350_v57 = vpop.f32.mrb[7].mxu0 }
 0x4a3   :  { %v6695_v8 = vpop.f32.mrb[8].mxu0 }
 0x4a4   :  { %v5185_v59 = vpop.f32.mrb[9].mxu0 }
 0x4a5   :  { %v6681_v20 = vpop.f32.mrb[2].mxu1 }
 0x4a6   :  { %v6968_v26 = vadd.f32 %v6681_v20, %v6457_v1  ;;  %v5092_v45 = vpop.f32.mrb[3].mxu1 }
 0x4a7   :  { %v6970_v24 = vadd.f32 %v5092_v45, %v3330_v6 }
 0x4a8   :  { %v6969_v38 = vadd.f32 %v6968_v26, %v6695_v8 }
 0x4a9   :  { %v6971_v40 = vadd.f32 %v6970_v24, %v5185_v59 }
 0x4aa   :  { %v8418_v5 = vadd.f32 %v6969_v38, %v5214_v56 }
 0x4ab   :  { %v8420_v19 = vadd.f32 %v6971_v40, %v5214_v56 }
 0x4ac   :  { %v5220_v16 = vsel %vm684_vm2, %v8418_v5, 0.0  ;;  %v5238_v0 = vmul.f32 %v8418_v5, %v8418_v5 }
 0x4ad   :  { %v5219_v53 = vsel %vm684_vm2, %v8420_v19, 0.0  ;;  %v5237_v2 = vmul.f32 %v8420_v19, %v8420_v19 }
 0x4ae   :  { %v5242_v13 = vsel %vm684_vm2, %v5238_v0, 0.0  ;;  %v5221_v61 = vadd.f32 %v5220_v16, %v5219_v53 }
 0x4af   :  { %v5241_v14 = vsel %vm684_vm2, %v5237_v2, 0.0 }
 0x4b0   :  { %v5222_v21 = vrot.slane %v5221_v61, 4  ;;  %v5243_v44 = vadd.f32 %v5242_v13, %v5241_v14 }
 0x4b1   :  { %v6698_v58 = vpop.f32.mrb[4].mxu1 }
 0x4b2   :  { %v5223_v49 = vadd.f32 %v5222_v21, %v5221_v61  ;;  %v5244_v30 = vrot.slane %v5243_v44, 4  ;;  %v6972_v25 = vadd.f32 %v6698_v58, %v6460_v35  ;;  %v5197_v12 = vpop.f32.mrb[5].mxu1 }
 0x4b3   :  { %v6973_v4 = vadd.f32 %v5197_v12, %v3350_v57 }
 0x4b4   :  { %v5224_v31 = vrot.slane %v5223_v49, 2  ;;  %v8432_v51 = vadd.f32 %v6972_v25, %v5214_v56  ;;  %v5245_v34 = vadd.f32 %v5244_v30, %v5243_v44 }
 0x4b5   :  { %v8434_v15 = vadd.f32 %v6973_v4, %v5214_v56 }
 0x4b6   :  { %v5225_v50 = vadd.f32 %v5224_v31, %v5223_v49  ;;  %v5229_v17 = vsel %vm684_vm2, %v8432_v51, 0.0  ;;  %v5240_v47 = vmul.f32 %v8432_v51, %v8432_v51  ;;  %v5246_v29 = vrot.slane %v5245_v34, 2 }
 0x4b7   :  { %v5228_v41 = vsel %vm684_vm2, %v8434_v15, 0.0  ;;  %v5239_v9 = vmul.f32 %v8434_v15, %v8434_v15 }
 0x4b8   :  { %v5226_v7 = vrot.slane %v5225_v50, 1  ;;  %v5251_v36 = vsel %vm684_vm2, %v5240_v47, 0.0  ;;  %v5230_v46 = vadd.f32 %v5229_v17, %v5228_v41  ;;  %v5247_v18 = vadd.f32 %v5246_v29, %v5245_v34 }
 0x4b9   :  { %v5250_v32 = vsel %vm684_vm2, %v5239_v9, 0.0 }
 0x4ba   :  { %v5227_v62 = vadd.f32 %v5226_v7, %v5225_v50  ;;  %v5231_v27 = vrot.slane %v5230_v46, 4  ;;  %v5252_v48 = vadd.f32 %v5251_v36, %v5250_v32  ;;  %v5248_v54 = vrot.slane %v5247_v18, 1 }
 0x4bc   :  { %v5232_v22 = vadd.f32 %v5231_v27, %v5230_v46  ;;  %v5253_v55 = vrot.slane %v5252_v48, 4  ;;  %5265 = vrot.lane.b32.xlu0 %v5227_v62, %s7259_s24  ;;  %5261 = vrot.lane.b32.xlu1 %v5227_v62, %s7260_s25  ;;  %v5249_v23 = vadd.f32 %v5248_v54, %v5247_v18  ;;  %v8721_v46 = vld [vmem:[#allocation14_spill] sm:$0xff] }
 0x4be   :  { %v5233_v60 = vrot.slane %v5232_v22, 2  ;;  %v5254_v3 = vadd.f32 %v5253_v55, %v5252_v48 }
 0x4c0   :  { %v5234_v42 = vadd.f32 %v5233_v60, %v5232_v22  ;;  %v5255_v33 = vrot.slane %v5254_v3, 2  ;;  %5273 = vrot.lane.b32.xlu0 %v5227_v62, %s7261_s26  ;;  %5269 = vrot.lane.b32.xlu1 %v5227_v62, %s7262_s27 }
 0x4c2   :  { %v5235_v37 = vrot.slane %v5234_v42, 1  ;;  %v5256_v11 = vadd.f32 %v5255_v33, %v5254_v3 }
 0x4c4   :  { %v5236_v43 = vadd.f32 %v5235_v37, %v5234_v42  ;;  %v5257_v28 = vrot.slane %v5256_v11, 1  ;;  %5281 = vrot.lane.b32.xlu0 %v5227_v62, %s7263_s28  ;;  %5277 = vrot.lane.b32.xlu1 %v5227_v62, %s7264_s29 }
 0x4c6   :  { %v5258_v63 = vadd.f32 %v5257_v28, %v5256_v11  ;;  %v5289_v1 = vrot.slane %v5236_v43, 7 }
 0x4c8   :  { %5377 = vrot.lane.b32.xlu0 %v5249_v23, %s7259_s24  ;;  %5285 = vrot.lane.b32.xlu1 %v5227_v62, %s7265_s30  ;;  %v5290_v6 = vsel %vm756_vm3, %v5289_v1, %v5227_v62  ;;  %v5401_v35 = vrot.slane %v5258_v63, 7  ;;  %v8722_v1 = vld [vmem:[#allocation15_spill] sm:$0xff] }
 0x4ca   :  { %v8456_v57 = vsel %vm756_vm3, %v5401_v35, %v5249_v23 }
 0x4cc   :  { %5385 = vrot.lane.b32.xlu0 %v5249_v23, %s7261_s26  ;;  %5373 = vrot.lane.b32.xlu1 %v5249_v23, %s7260_s25 }
 0x4d0   :  { %5263 = vrot.lane.b32.xlu0 %v5236_v43, %s7260_s25  ;;  %5381 = vrot.lane.b32.xlu1 %v5249_v23, %s7262_s27 }
 0x4d4   :  { %5271 = vrot.lane.b32.xlu0 %v5236_v43, %s7262_s27  ;;  %5389 = vrot.lane.b32.xlu1 %v5249_v23, %s7264_s29 }
 0x4d8   :  { %5279 = vrot.lane.b32.xlu0 %v5236_v43, %s7264_s29  ;;  %5267 = vrot.lane.b32.xlu1 %v5236_v43, %s7259_s24 }
 0x4dc   :  { %5287 = vrot.lane.b32.xlu0 %v5236_v43, %s7265_s30  ;;  %5275 = vrot.lane.b32.xlu1 %v5236_v43, %s7261_s26 }
 0x4e0   :  { %5375 = vrot.lane.b32.xlu0 %v5258_v63, %s7260_s25  ;;  %5283 = vrot.lane.b32.xlu1 %v5236_v43, %s7263_s28 }
 0x4e4   :  { %5383 = vrot.lane.b32.xlu0 %v5258_v63, %s7262_s27  ;;  %5379 = vrot.lane.b32.xlu1 %v5258_v63, %s7259_s24 }
 0x4e8   :  { %5391 = vrot.lane.b32.xlu0 %v5258_v63, %s7264_s29  ;;  %5387 = vrot.lane.b32.xlu1 %v5258_v63, %s7261_s26 }
 0x4ec   :  { %5399 = vrot.lane.b32.xlu0 %v5258_v63, %s7265_s30  ;;  %5395 = vrot.lane.b32.xlu1 %v5258_v63, %s7263_s28 }
 0x4f0   :  { %5393 = vrot.lane.b32.xlu0 %v5249_v23, %s7263_s28  ;;  %5397 = vrot.lane.b32.xlu1 %v5249_v23, %s7265_s30 }
 0x52e   :  { %v5266_v39 = vpop.permute.xlu0 %5265  ;;  %v5262_v8 = vpop.permute.xlu1 %5261 }
 0x532   :  { %v5274_v59 = vpop.permute.xlu0 %5273  ;;  %v5270_v20 = vpop.permute.xlu1 %5269 }
 0x536   :  { %v5282_v26 = vpop.permute.xlu0 %5281  ;;  %v5278_v56 = vpop.permute.xlu1 %5277 }
 0x53a   :  { %v5378_v45 = vpop.permute.xlu0 %5377  ;;  %v5286_v24 = vpop.permute.xlu1 %5285 }
 0x53e   :  { %v8478_v38 = vpop.permute.xlu0 %5385  ;;  %v5374_v40 = vpop.permute.xlu1 %5373 }
 0x542   :  { %v5264_v16 = vpop.permute.xlu0 %5263  ;;  %v5382_v0 = vpop.permute.xlu1 %5381 }
 0x543   :  { %v5291_v44 = vrot.slane %v5264_v16, 7 }
 0x545   :  { %v5292_v50 = vsel %vm756_vm3, %v5291_v44, %v5262_v8 }
 0x546   :  { %v5272_v53 = vpop.permute.xlu0 %5271  ;;  %v8480_v2 = vpop.permute.xlu1 %5389 }
 0x547   :  { %v5295_v14 = vrot.slane %v5272_v53, 7 }
 0x549   :  { %v5296_v25 = vsel %vm756_vm3, %v5295_v14, %v5270_v20 }
 0x54a   :  { %v5280_v13 = vpop.permute.xlu0 %5279  ;;  %v5268_v61 = vpop.permute.xlu1 %5267  ;;  %v5321_v47 = vcombine.low %v5292_v50, %v5296_v25 }
 0x54b   :  { %v5293_v21 = vrot.slane %v5268_v61, 7  ;;  %v5299_v12 = vrot.slane %v5280_v13, 7 }
 0x54c   :  { %v5328_v48 = vrot.slane %v5321_v47, %v8721_v46 }
 0x54d   :  { %v5294_v58 = vsel %vm756_vm3, %v5293_v21, %v5266_v39  ;;  %v5300_v7 = vsel %vm756_vm3, %v5299_v12, %v5278_v56 }
 0x54e   :  { %v5288_v49 = vpop.permute.xlu0 %5287  ;;  %v5276_v30 = vpop.permute.xlu1 %5275  ;;  %v5313_v31 = vcombine.low %v5290_v6, %v5294_v58 }
 0x54f   :  { %v5303_v4 = vrot.slane %v5288_v49, 7  ;;  %v5297_v17 = vrot.slane %v5276_v30, 7 }
 0x550   :  { %v5320_v32 = vrot.slane %v5313_v31, %v8721_v46 }
 0x551   :  { %v5304_v34 = vsel %vm756_vm3, %v5303_v4, %v5286_v24  ;;  %v5298_v29 = vsel %vm756_vm3, %v5297_v17, %v5274_v59 }
 0x552   :  { %v5376_v41 = vpop.permute.xlu0 %5375  ;;  %v5284_v9 = vpop.permute.xlu1 %5283  ;;  %v5337_v62 = vcombine.low %v5300_v7, %v5304_v34  ;;  %v5345_v54 = vcombine.low %v5320_v32, %v5328_v48 }
 0x553   :  { %v5301_v36 = vrot.slane %v5284_v9, 7  ;;  %v5403_v37 = vrot.slane %v5376_v41, 7 }
 0x554   :  { %v5344_v42 = vrot.slane %v5337_v62, %v8721_v46  ;;  %v5352_v6 = vrot.slane %v5345_v54, %v8722_v1 }
 0x555   :  { %v5302_v27 = vsel %vm756_vm3, %v5301_v36, %v5282_v26  ;;  %v5404_v39 = vsel %vm756_vm3, %v5403_v37, %v5374_v40 }
 0x556   :  { %v5329_v22 = vcombine.low %v5298_v29, %v5302_v27  ;;  %v5384_v55 = vpop.permute.xlu0 %5383  ;;  %v5380_v18 = vpop.permute.xlu1 %5379  ;;  %v8723_v29 = vmov 0.0  }
 0x557   :  { %v5407_v60 = vrot.slane %v5384_v55, 7  ;;  %v5405_v3 = vrot.slane %v5380_v18, 7 }
 0x558   :  { %v5336_v33 = vrot.slane %v5329_v22, %v8721_v46 }
 0x559   :  { %v5408_v23 = vsel %vm756_vm3, %v5407_v60, %v5382_v0  ;;  %v5406_v63 = vsel %vm756_vm3, %v5405_v3, %v5378_v45 }
 0x55a   :  { %v5392_v11 = vpop.permute.xlu0 %5391  ;;  %v5388_v43 = vpop.permute.xlu1 %5387  ;;  %v5353_v28 = vcombine.low %v5336_v33, %v5344_v42  ;;  %v5433_v8 = vcombine.low %v5404_v39, %v5408_v23  ;;  %v5425_v59 = vcombine.low %v8456_v57, %v5406_v63 }
 0x55b   :  { %v5411_v16 = vrot.slane %v5392_v11, 7  ;;  %v5409_v53 = vrot.slane %v5388_v43, 7 }
 0x55c   :  { %v5360_v35 = vrot.slane %v5353_v28, %v8722_v1  ;;  %v5440_v14 = vrot.slane %v5433_v8, %v8721_v46  ;;  %v5432_v40 = vrot.slane %v5425_v59, %v8721_v46 }
 0x55d   :  { %v5410_v44 = vsel %vm756_vm3, %v5409_v53, %v8478_v38  ;;  %v5412_v49 = vsel %vm756_vm3, %v5411_v16, %v8480_v2 }
 0x55e   :  { %v5400_v20 = vpop.permute.xlu0 %5399  ;;  %v5396_v26 = vpop.permute.xlu1 %5395  ;;  %v5362_v56 = vcombine.high %v5352_v6, %v5360_v35  ;;  %v5361_v24 = vcombine.low %v5352_v6, %v5360_v35  ;;  %v5457_v50 = vcombine.low %v5432_v40, %v5440_v14 }
 0x55f   :  { %v5415_v45 = vrot.slane %v5400_v20, 7  ;;  %v5413_v61 = vrot.slane %v5396_v26, 7 }
 0x560   :  { %v5366_v13 = vsel %vm830_vm10, %v5362_v56, 0.0  ;;  %v5363_v0 = vsel %vm830_vm10, %v5361_v24, 0.0  ;;  %v5464_v17 = vrot.slane %v5457_v50, %v8722_v1 }
 0x561   :  { %5367 = vadd.xlane.f32.xlu1 %v5366_v13  ;;  %5364 = vadd.xlane.f32.xlu0 %v5363_v0 }
 0x562   :  { %v5394_v21 = vpop.permute.xlu0 %5393  ;;  %v5398_v57 = vpop.permute.xlu1 %5397 }
 0x563   :  { %v5414_v58 = vsel %vm756_vm3, %v5413_v61, %v5394_v21  ;;  %v5416_v30 = vsel %vm756_vm3, %v5415_v45, %v5398_v57 }
 0x564   :  { %v5441_v25 = vcombine.low %v5410_v44, %v5414_v58  ;;  %v5449_v12 = vcombine.low %v5412_v49, %v5416_v30 }
 0x566   :  { %v5448_v4 = vrot.slane %v5441_v25, %v8721_v46  ;;  %v5456_v31 = vrot.slane %v5449_v12, %v8721_v46 }
 0x568   :  { %v5465_v34 = vcombine.low %v5448_v4, %v5456_v31 }
 0x56a   :  { %v5472_v47 = vrot.slane %v5465_v34, %v8722_v1 }
 0x56c   :  { %v5473_v38 = vcombine.low %v5464_v17, %v5472_v47  ;;  %v5474_v9 = vcombine.high %v5464_v17, %v5472_v47  ;;  %v674_v47 = vsub.s32 7, %v7396_v52 }
 0x56e   :  { %v5475_v41 = vsel %vm830_vm10, %v5473_v38, 0.0  ;;  %v5478_v2 = vsel %vm830_vm10, %v5474_v9, 0.0 }
 0x56f   :  { %5476 = vadd.xlane.f32.xlu0 %v5475_v41  ;;  %v675_v41 = vrot.slane %v8415_v10, %v674_v47 }
 0x573   :  { %5479 = vadd.xlane.f32.xlu0 %v5478_v2 }
 0x5ee   :  { %v5368_v7 = vpop.xlane.xlu1 %5367  ;;  %v5365_v36 = vpop.xlane.xlu0 %5364 }
 0x5ef   :  { %v5370_v32 = vmul.f32 0.015625, %v5368_v7  ;;  %v5369_v62 = vmul.f32 0.015625, %v5365_v36 }
 0x5f1   :  { %v5506_v27 = vcombine.high %v5370_v32, %v8723_v29  ;;  %v5513_v48 = vrot.slane %v5370_v32, %v8721_v46  ;;  %v5491_v22 = vcombine.high %v5369_v62, %v8723_v29  ;;  %v5498_v55 = vrot.slane %v5369_v62, %v8721_v46 }
 0x5f2   :  { %v5483_v23 = vmul.f32 %v5369_v62, %v5369_v62  ;;  %v5484_v59 = vmul.f32 %v5370_v32, %v5370_v32 }
 0x5f3   :  { %v5521_v18 = vcombine.low %v5498_v55, %v5513_v48  ;;  %v5522_v60 = vcombine.high %v5498_v55, %v5513_v48  ;;  %v5520_v3 = vrot.slane %v5506_v27, %v8721_v46  ;;  %v5505_v42 = vrot.slane %v5491_v22, %v8721_v46 }
 0x5f5   :  { %v5536_v33 = vrot.slane %v5522_v60, %v8722_v1  ;;  %v8523_v54 = vrot.slane %v5521_v18, %v8722_v1  ;;  %v5537_v43 = vcombine.low %v5505_v42, %v5520_v3  ;;  %v5538_v57 = vcombine.high %v5505_v42, %v5520_v3 }
 0x5f7   :  { %5562 = vrot.lane.b32.xlu0 %v5536_v33, %s7258_s8  ;;  %v5553_v37 = vcombine.high %v8523_v54, %v8723_v29  ;;  %v5554_v11 = vcombine.high %v5536_v33, %v8723_v29  ;;  %v5545_v6 = vrot.slane %v5537_v43, %v8722_v1  ;;  %v5552_v30 = vrot.slane %v5538_v57, %v8722_v1 }
 0x5f8   :  { %v5695_v33 = vsub.s32 4, %v7396_v52 }
 0x5f9   :  { %5558 = vrot.lane.b32.xlu1 %v5553_v37, %s7271_s1  ;;  %v5555_v26 = vcombine.high %v5545_v6, %v8723_v29  ;;  %v5556_v31 = vcombine.high %v5552_v30, %v8723_v29 }
 0x5fb   :  { %5566 = vrot.lane.b32.xlu0 %v5554_v11, %s7272_s4 }
 0x5fc   :  { %v5477_v28 = vpop.xlane.xlu0 %5476 }
 0x5fd   :  { %v5481_v63 = vmul.f32 0.015625, %v5477_v28  ;;  %v5696_v28 = vrot.slane %v8415_v10, %v5695_v33 }
 0x5ff   :  { %v5485_v35 = vsub.f32 %v5481_v63, %v5483_v23  ;;  %5570 = vrot.lane.b32.xlu0 %v5545_v6, %s7273_s15  ;;  %v5701_v23 = vsub.s32 5, %v7396_v52 }
 0x600   :  { %v5480_v39 = vpop.xlane.xlu0 %5479 }
 0x601   :  { %v5487_v8 = vadd.f32 1e-05, %v5485_v35  ;;  %v5482_v20 = vmul.f32 0.015625, %v5480_v39 }
 0x603   :  { %v5486_v56 = vsub.f32 %v5482_v20, %v5484_v59  ;;  %5574 = vrot.lane.b32.xlu0 %v5555_v26, %s7274_s16  ;;  %7178 = vrsqrt.f32 %v5487_v8  ;;  %v5702_v26 = vrot.slane %v8415_v10, %v5701_v23 }
 0x605   :  { %v5488_v24 = vadd.f32 1e-05, %v5486_v56 }
 0x607   :  { %7180 = vrsqrt.f32 %v5488_v24 }
 0x60d   :  { %v7179_v16 = vpop.eup %7178 }
 0x60e   :  { %v5599_v13 = vrot.slane %v7179_v16, %v8721_v46  ;;  %v5592_v44 = vcombine.high %v7179_v16, %v8723_v29  ;;  %v8724_v16 = vld [vmem:[#allocation13_spill] sm:$0xff] }
 0x610   :  { %v5606_v25 = vrot.slane %v5592_v44, %v8721_v46 }
 0x611   :  { %v7181_v53 = vpop.eup %7180 }
 0x612   :  { %v5614_v0 = vrot.slane %v7181_v53, %v8721_v46  ;;  %v5607_v14 = vcombine.high %v7181_v53, %v8723_v29 }
 0x614   :  { %v5623_v45 = vcombine.high %v5599_v13, %v5614_v0  ;;  %v5622_v61 = vcombine.low %v5599_v13, %v5614_v0  ;;  %v5621_v49 = vrot.slane %v5607_v14, %v8721_v46  ;;  %v8725_v0 = vld [vmem:[#allocation9_spill] sm:$0xff] }
 0x616   :  { %v5637_v40 = vrot.slane %v5623_v45, %v8722_v1  ;;  %v5630_v21 = vrot.slane %v5622_v61, %v8722_v1  ;;  %v5638_v4 = vcombine.low %v5606_v25, %v5621_v49  ;;  %v5639_v34 = vcombine.high %v5606_v25, %v5621_v49  ;;  %v8726_v61 = vld [vmem:[#allocation10_spill] sm:$0xff] }
 0x618   :  { %5663 = vrot.lane.b32.xlu0 %v5637_v40, %s7258_s8  ;;  %v5654_v58 = vcombine.high %v5630_v21, %v8723_v29  ;;  %v5655_v12 = vcombine.high %v5637_v40, %v8723_v29  ;;  %v5646_v50 = vrot.slane %v5638_v4, %v8722_v1  ;;  %v5653_v17 = vrot.slane %v5639_v34, %v8722_v1 }
 0x61a   :  { %5659 = vrot.lane.b32.xlu1 %v5654_v58, %s7271_s1  ;;  %v5656_v46 = vcombine.high %v5646_v50, %v8723_v29  ;;  %v5657_v38 = vcombine.high %v5653_v17, %v8723_v29  ;;  %v8727_v58 = vld [vmem:[#allocation8_spill] sm:$0xff] }
 0x61c   :  { %5578 = vrot.lane.b32.xlu0 %v5552_v30, %s7275_s3  ;;  %v8728_v30 = vld [vmem:[#allocation11_spill] sm:$0xff] }
 0x61e   :  { %5667 = vrot.lane.b32.xlu1 %v5655_v12, %s7272_s4  ;;  %v8729_v12 = vld [vmem:[#allocation12_spill] sm:$0xff] }
 0x620   :  { %5582 = vrot.lane.b32.xlu0 %v5556_v31, %s7276_s17 }
 0x622   :  { %5671 = vrot.lane.b32.xlu1 %v5646_v50, %s7273_s15 }
 0x626   :  { %5679 = vrot.lane.b32.xlu1 %v5653_v17, %s7275_s3 }
 0x62a   :  { %5675 = vrot.lane.b32.xlu1 %v5656_v46, %s7274_s16 }
 0x62e   :  { %5683 = vrot.lane.b32.xlu1 %v5657_v38, %s7276_s17 }
 0x632   :  { %677 = vrot.lane.b32.xlu1 %v675_v41, %s7277_s5 }
 0x669   :  { %v5563_v9 = vpop.permute.xlu0 %5562 }
 0x66b   :  { %v5559_v1 = vpop.permute.xlu1 %5558 }
 0x66c   :  { %v5585_v3 = vsel %vm830_vm10, %v8523_v54, %v5559_v1 }
 0x66d   :  { %v5567_v2 = vpop.permute.xlu0 %5566  ;;  %v5586_v37 = vsel %vm1054_vm9, %v5585_v3, %v5563_v9 }
 0x66e   :  { %v5587_v6 = vsel %vm1056_vm11, %v5586_v37, %v5567_v2 }
 0x671   :  { %v5571_v7 = vpop.permute.xlu0 %5570 }
 0x672   :  { %v5588_v35 = vsel %vm1058_vm12, %v5587_v6, %v5571_v7 }
 0x675   :  { %v5575_v36 = vpop.permute.xlu0 %5574 }
 0x676   :  { %v5589_v8 = vsel %vm46_vm1, %v5588_v35, %v5575_v36 }
 0x68a   :  { %v5664_v27 = vpop.permute.xlu0 %5663 }
 0x68c   :  { %v5660_v32 = vpop.permute.xlu1 %5659 }
 0x68d   :  { %v5686_v62 = vsel %vm830_vm10, %v5630_v21, %v5660_v32 }
 0x68e   :  { %v5687_v22 = vsel %vm1054_vm9, %v5686_v62, %v5664_v27  ;;  %v5579_v42 = vpop.permute.xlu0 %5578 }
 0x68f   :  { %v5590_v20 = vsel %vm1061_vm14, %v5589_v8, %v5579_v42 }
 0x690   :  { %v5668_v48 = vpop.permute.xlu1 %5667 }
 0x691   :  { %v5688_v29 = vsel %vm1056_vm11, %v5687_v22, %v5668_v48 }
 0x692   :  { %v5583_v39 = vpop.permute.xlu0 %5582 }
 0x693   :  { %v5591_v24 = vsel %vm1063_vm13, %v5590_v20, %v5583_v39 }
 0x694   :  { %v5672_v55 = vpop.permute.xlu1 %5671 }
 0x695   :  { %v5689_v18 = vsel %vm1058_vm12, %v5688_v29, %v5672_v55 }
 0x698   :  { %v5680_v60 = vpop.permute.xlu1 %5679 }
 0x69c   :  { %v5676_v11 = vpop.permute.xlu1 %5675 }
 0x69d   :  { %v5690_v43 = vsel %vm46_vm1, %v5689_v18, %v5676_v11 }
 0x69e   :  { %v5691_v63 = vsel %vm1061_vm14, %v5690_v43, %v5680_v60 }
 0x6a0   :  { %v5684_v54 = vpop.permute.xlu1 %5683 }
 0x6a1   :  { %v5692_v59 = vsel %vm1063_vm13, %v5691_v63, %v5684_v54 }
 0x6a2   :  { %v5697_v56 = vmul.f32 %v5696_v28, %v5692_v59 }
 0x6a4   :  { %v5698_v52 = vmul.f32 %v5697_v56, %v5591_v24  ;;  %v5711_v53 = vrot.slane %v5697_v56, %v8724_v16  ;;  %v678_v13 = vpop.permute.xlu1 %677 }
 0x6a5   :  { %v681_v45 = vadd.f32 %v8725_v0, %v678_v13  ;;  %v680_v14 = vadd.f32 %v678_v13, %v8726_v61  ;;  %v683_v25 = vadd.f32 %v8728_v30, %v678_v13  ;;  %v682_v4 = vadd.f32 %v678_v13, %v8729_v12 }
 0x6a6   :  { %v5703_v40 = vsub.f32 %v5702_v26, %v5698_v52  ;;  %v5712_v21 = vcombine.high %v5711_v53, %v5711_v53  ;;  %v5719_v57 = vrot.slane %v5711_v53, %v8724_v16 }
 0x6a7   :  { %5848 = vrot.lane.b32.xlu0 %v681_v45, %s7278_s2  ;;  %5846 = vrot.lane.b32.xlu1 %v680_v14, %s7278_s2 }
 0x6a8   :  { %v5726_v10 = vrot.slane %v5712_v21, %v8724_v16  ;;  %v5748_v44 = vrot.slane %v5703_v40, %v8724_v16  ;;  %v5730_v49 = vrot.slane %v5719_v57, %v8727_v58 }
 0x6aa   :  { %v5734_v31 = vrot.slane %v5726_v10, %v8727_v58  ;;  %v5749_v50 = vcombine.high %v5748_v44, %v5748_v44  ;;  %v5756_v34 = vrot.slane %v5748_v44, %v8724_v16  ;;  %v5737_v46 = vmul.f32 %v5730_v49, %v8420_v19 }
 0x6ab   :  { %5852 = vrot.lane.b32.xlu0 %v683_v25, %s7278_s2  ;;  %5850 = vrot.lane.b32.xlu1 %v682_v4, %s7278_s2  ;;  %v5738_v47 = vmul.f32 %v5730_v49, %v8418_v5 }
 0x6ac   :  { %v5763_v17 = vrot.slane %v5749_v50, %v8724_v16  ;;  %v5767_v38 = vrot.slane %v5756_v34, %v8727_v58  ;;  %v5739_v41 = vmul.f32 %v5734_v31, %v8434_v15  ;;  %v5740_v2 = vmul.f32 %v5734_v31, %v8432_v51 }
 0x6ae   :  { %v5771_v9 = vrot.slane %v5763_v17, %v8727_v58  ;;  %v8599_v7 = vadd.f32 %v5767_v38, %v5737_v46  ;;  %v8601_v1 = vadd.f32 %v5767_v38, %v5738_v47 }
 0x6b0   :  { %v8603_v36 = vadd.f32 %v5771_v9, %v5739_v41  ;;  %v8605_v32 = vadd.f32 %v5771_v9, %v5740_v2  ;;  %v5782_v19 = vmin.f32 %v8599_v7, 20.0  ;;  %v5783_v5 = vmin.f32 %v8601_v1, 20.0 }
 0x6b1   :  { %vm5778_vm9 = vcmp.gt.f32.partialorder %v8599_v7, 20.0  ;;  %vm5779_vm10 = vcmp.gt.f32.partialorder %v8601_v1, 20.0 }
 0x6b2   :  { %v5786_v62 = vmul.f32 1.442695, %v5782_v19  ;;  %v5784_v27 = vmin.f32 %v8603_v36, 20.0  ;;  %v5788_v15 = vmul.f32 1.442695, %v5783_v5  ;;  %v5785_v48 = vmin.f32 %v8605_v32, 20.0 }
 0x6b3   :  { %vm5780_vm13 = vcmp.gt.f32.partialorder %v8603_v36, 20.0  ;;  %vm5781_vm14 = vcmp.gt.f32.partialorder %v8605_v32, 20.0 }
 0x6b4   :  { %7182 = vpow2.f32 %v5786_v62  ;;  %v5790_v51 = vmul.f32 1.442695, %v5784_v27  ;;  %v5792_v22 = vmul.f32 1.442695, %v5785_v48 }
 0x6b5   :  { %7184 = vpow2.f32 %v5788_v15 }
 0x6b6   :  { %7186 = vpow2.f32 %v5790_v51 }
 0x6b7   :  { %7188 = vpow2.f32 %v5792_v22 }
 0x6be   :  { %v7183_v29 = vpop.eup %7182 }
 0x6bf   :  { %v7185_v55 = vpop.eup %7184  ;;  %v5794_v18 = vadd.f32 1.0, %v7183_v29  ;;  %v5797_v11 = vmul.f32 -0.5, %v7183_v29  ;;  %v5800_v35 = vand.u32 2147483647, %v7183_v29 }
 0x6c0   :  { %v7187_v60 = vpop.eup %7186  ;;  %v5803_v3 = vadd.f32 1.0, %v7185_v55  ;;  %v5806_v43 = vmul.f32 -0.5, %v7185_v55  ;;  %v5809_v59 = vand.u32 2147483647, %v7185_v55 }
 0x6c1   :  { %v7189_v42 = vpop.eup %7188  ;;  %7190 = vlog2.f32 %v5794_v18  ;;  %v5812_v33 = vadd.f32 1.0, %v7187_v60  ;;  %v5798_v63 = vadd.f32 1.0, %v5797_v11  ;;  %v5815_v6 = vmul.f32 -0.5, %v7187_v60 }
 0x6c2   :  { %7192 = vlog2.f32 %v5803_v3  ;;  %v5821_v37 = vadd.f32 1.0, %v7189_v42  ;;  %v5807_v39 = vadd.f32 1.0, %v5806_v43  ;;  %v5824_v54 = vmul.f32 -0.5, %v7189_v42 }
 0x6c3   :  { %7194 = vlog2.f32 %v5812_v33  ;;  %v5799_v24 = vmul.f32 %v7183_v29, %v5798_v63  ;;  %v5816_v52 = vadd.f32 1.0, %v5815_v6  ;;  %vm5801_vm1 = vcmp.lt.f32.partialorder %v5800_v35, 0.0004427343 }
 0x6c4   :  { %7196 = vlog2.f32 %v5821_v37  ;;  %v5808_v16 = vmul.f32 %v7185_v55, %v5807_v39  ;;  %v5818_v53 = vand.u32 2147483647, %v7187_v60  ;;  %v5825_v13 = vadd.f32 1.0, %v5824_v54 }
 0x6c5   :  { %vm5810_vm3 = vcmp.lt.f32.partialorder %v5809_v59, 0.0004427343  ;;  %v5827_v61 = vand.u32 2147483647, %v7189_v42  ;;  %v5817_v21 = vmul.f32 %v7187_v60, %v5816_v52 }
 0x6c6   :  { %vm5819_vm11 = vcmp.lt.f32.partialorder %v5818_v53, 0.0004427343  ;;  %v5826_v10 = vmul.f32 %v7189_v42, %v5825_v13 }
 0x6c7   :  { %vm5828_vm12 = vcmp.lt.f32.partialorder %v5827_v61, 0.0004427343 }
 0x6cb   :  { %v7191_v28 = vpop.eup %7190 }
 0x6cc   :  { %v7193_v23 = vpop.eup %7192  ;;  %v5796_v8 = vmul.f32 0.6931472, %v7191_v28 }
 0x6cd   :  { %v7195_v20 = vpop.eup %7194  ;;  %v5805_v26 = vmul.f32 0.6931472, %v7193_v23 }
 0x6ce   :  { %v7197_v56 = vpop.eup %7196  ;;  %v5802_v0 = vsel %vm5801_vm1, %v5799_v24, %v5796_v8  ;;  %v5814_v45 = vmul.f32 0.6931472, %v7195_v20 }
 0x6cf   :  { %v5811_v14 = vsel %vm5810_vm3, %v5808_v16, %v5805_v26  ;;  %v5823_v40 = vmul.f32 0.6931472, %v7197_v56  ;;  %v5830_v57 = vsel %vm5778_vm9, %v8599_v7, %v5802_v0 }
 0x6d0   :  { %v5831_v44 = vsel %vm5779_vm10, %v8601_v1, %v5811_v14  ;;  %v5820_v58 = vsel %vm5819_vm11, %v5817_v21, %v5814_v45  ;;  %7198 = vtanh.f32 %v5830_v57 }
 0x6d1   :  { %v5829_v49 = vsel %vm5828_vm12, %v5826_v10, %v5823_v40  ;;  %7200 = vtanh.f32 %v5831_v44  ;;  %v5832_v30 = vsel %vm5780_vm13, %v8603_v36, %v5820_v58 }
 0x6d2   :  { %v5833_v25 = vsel %vm5781_vm14, %v8605_v32, %v5829_v49  ;;  %7202 = vtanh.f32 %v5832_v30 }
 0x6d3   :  { %7204 = vtanh.f32 %v5833_v25 }
 0x6da   :  { %v7199_v12 = vpop.eup %7198 }
 0x6db   :  { %v7201_v4 = vpop.eup %7200  ;;  %v5838_v50 = vmul.f32 %v7199_v12, %v8599_v7 }
 0x6dc   :  { %v7203_v31 = vpop.eup %7202  ;;  %v5839_v34 = vmul.f32 %v7201_v4, %v8601_v1 }
 0x6dd   :  { %v7205_v17 = vpop.eup %7204  ;;  %v5840_v9 = vmul.f32 %v7203_v31, %v8603_v36 }
 0x6de   :  { %v5841_v2 = vmul.f32 %v7205_v17, %v8605_v32 }
 0x719   :  { %v5847_v46 = vpop.permute.xlu1 %5846  ;;  %v5849_v47 = vpop.permute.xlu0 %5848 }
 0x71a   :  { %v5858_v38 = vadd.f32 %v5847_v46, %v5838_v50  ;;  %v5859_v41 = vadd.f32 %v5849_v47, %v5839_v34 }
 0x71c   :  { %5862 = vst.msk [vmem:[#allocation5] sm:$0xff] %vm684_vm2, %v5858_v38  ;;  %5863 = vst.msk [vmem:[#allocation5 + $0x8] sm:$0xff] %vm684_vm2, %v5859_v41 }
 0x71d   :  { %v5851_v19 = vpop.permute.xlu1 %5850  ;;  %v5853_v5 = vpop.permute.xlu0 %5852 }
 0x71e   :  { %v5860_v7 = vadd.f32 %v5851_v19, %v5840_v9  ;;  %v5861_v62 = vadd.f32 %v5853_v5, %v5841_v2 }
 0x720   :  { %5864 = vst.msk [vmem:[#allocation5 + $0x10] sm:$0xff] %vm684_vm2, %v5860_v7  ;;  %5865 = vst.msk [vmem:[#allocation5 + $0x18] sm:$0xff] %vm684_vm2, %v5861_v62 }
 0x721   :  { %7241 = shalt.err (!%p7238_p12)
}
 0x722   :  { %s7242_s26 = scalar_lea.hbm %s8648_s6, 512 }
 0x723   :  { %p7243_p13 = scmp.ne.s32.totalorder %s8648_s6, %s7242_s26  ;;  %p7246_p0 = scmp.lt.u32.totalorder %s7242_s26, %s8648_s6 }
 0x725   :  { %p7248_p1 = pnand %p7246_p0, %p7243_p13 }
 0x727   :  { %7251 = shalt.err (!%p7248_p1)
}
 0x728   :  { %5877 = dma.vmem_to_hbm [thread:$0]  %s5872_s0, 512, %s8648_s6, [#allocation4], %s7257_s7, %s7257_s7, %s7258_s8  }
 0x729   :  { %7254 = dma.done.wait [#allocation4], 512  }
 0x72a   :  { %7255 = vsyncadd [#allocation4], 4294966784 }
 0x72b   :  { %5881 = vsyncpa [#allocation3], 1 }
 0x72c   :  { %5882 = vsyncpa [#allocation4], 1 }

</bundles_post_ra>
